<compile_context>
chip_gen: v6e
topology: v6e:2x2x1
jax: 0.10.0
libtpu: 0.0.40
codegen_flags: <defaults>
</compile_context>

<pallas_src>
import functools

import jax
import jax.numpy as jnp
from jax.experimental import pallas as pl
from jax.experimental.pallas import tpu as pltpu

D_IN = 768
D_HID = 128


def ae_kernel(x_ref, w1_ref, b1_ref, w2_ref, b2_ref, o_ref, *, compute_dtype):
    # Cast HBM-heavy operands to the MXU compute dtype inside the kernel
    # (cheap VPU work on VMEM-resident tiles; avoids extra HBM cast passes).
    x = x_ref[...].astype(compute_dtype)
    w1 = w1_ref[...].astype(compute_dtype)
    # encoder: (tm, 768) @ (768, 128) with f32 accumulation on the MXU
    h = jnp.dot(x, w1, preferred_element_type=jnp.float32)
    h = jnp.maximum(h + b1_ref[...], 0.0)                     # bias + ReLU (f32)
    # decoder: (tm, 128) @ (128, 768) with f32 accumulation on the MXU
    w2 = w2_ref[...].astype(compute_dtype)
    o = jnp.dot(h.astype(compute_dtype), w2, preferred_element_type=jnp.float32)
    o_ref[...] = (o + b2_ref[...]).astype(o_ref.dtype)


def _round_up(n, m):
    return ((n + m - 1) // m) * m


def _choose_tile(batch, tm_max):
    """Pick a batch tile: multiple of 8, <= tm_max, and (when the batch allows)
    at least 2 grid steps so both v7x TensorCores get work, with minimal padding."""
    tm_max = max(8, _round_up(min(tm_max, batch), 8))
    num_tiles = pl.cdiv(batch, tm_max)
    if batch >= 16:
        num_tiles = max(num_tiles, 2)
    return max(8, _round_up(pl.cdiv(batch, num_tiles), 8))


def _forward_2d(x2, w1, b1, w2, b2, tm, compute_dtype, out_dtype):
    B = x2.shape[0]
    tm_eff = _choose_tile(B, tm)
    grid_m = pl.cdiv(B, tm_eff)
    B_pad = grid_m * tm_eff

    # No wrapper-side dtype casts: x / W1 / W2 go to the kernel as-is and are
    # cast on-chip. Only pad the ragged batch tail (rare, row-independent).
    x_c = x2 if B_pad == B else jnp.pad(x2, ((0, B_pad - B), (0, 0)))
    b1_c = b1.reshape(1, D_HID).astype(jnp.float32)
    b2_c = b2.reshape(1, D_IN).astype(jnp.float32)

    out_shape = jax.ShapeDtypeStruct((B_pad, D_IN), out_dtype)

    bytes_accessed = (
        B_pad * D_IN * x_c.dtype.itemsize
        + B_pad * D_IN * jnp.dtype(out_dtype).itemsize
        + w1.size * w1.dtype.itemsize
        + w2.size * w2.dtype.itemsize
        + b1_c.size * 4 + b2_c.size * 4
    )
    cost = pl.CostEstimate(
        flops=4 * B_pad * D_IN * D_HID,   # two matmuls * 2*M*K*N
        transcendentals=0,
        bytes_accessed=int(bytes_accessed),
    )

    kernel = functools.partial(ae_kernel, compute_dtype=compute_dtype)

    def build(single_buffer_weights):
        def wspec(shape):
            # Weights/biases are grid-invariant -> single-buffer them to save VMEM.
            if single_buffer_weights:
                return pl.BlockSpec(shape, lambda i: (0, 0),
                                    pipeline_mode=pl.Buffered(1))
            return pl.BlockSpec(shape, lambda i: (0, 0))

        grid_spec = pltpu.PrefetchScalarGridSpec(
            num_scalar_prefetch=0,
            grid=(grid_m,),
            in_specs=[
                pl.BlockSpec((tm_eff, D_IN), lambda i: (i, 0)),   # x tile
                wspec((D_IN, D_HID)),                             # W1 (full, resident)
                wspec((1, D_HID)),                                # b1
                wspec((D_HID, D_IN)),                             # W2 (full, resident)
                wspec((1, D_IN)),                                 # b2
            ],
            out_specs=pl.BlockSpec((tm_eff, D_IN), lambda i: (i, 0)),
        )
        return pl.pallas_call(
            kernel,
            out_shape=out_shape,
            grid_spec=grid_spec,
            compiler_params=pltpu.CompilerParams(
                dimension_semantics=("parallel",),
                vmem_limit_bytes=48 * 1024 * 1024,
            ),
            cost_estimate=cost,
        )

    try:
        out = build(True)(x_c, w1, b1_c, w2, b2_c)
    except Exception:
        # Fallback for JAX versions without per-operand pipeline_mode buffering.
        out = build(False)(x_c, w1, b1_c, w2, b2_c)

    return out[:B] if B_pad != B else out


def my_ae_128_forward(x, w1, b1, w2, b2, *, tm=1024,
                      compute_dtype=jnp.bfloat16, out_dtype=None):
    """x: [..., 768]. Returns relu(x @ W1 + b1) @ W2 + b2 with shape [..., 768].

    Matmuls run in `compute_dtype` on the MXU with f32 accumulation; the output
    is written in `out_dtype` (defaults to x.dtype, matching PyTorch semantics).
    """
    if out_dtype is None:
        out_dtype = x.dtype
    orig_shape = x.shape
    assert orig_shape[-1] == D_IN
    x2 = x.reshape(-1, D_IN)
    out = _forward_2d(x2, w1, b1, w2, b2, tm, compute_dtype, out_dtype)
    return out.reshape(*orig_shape[:-1], D_IN)


def init_params(key):
    """Deterministic init mimicking nn.Linear's U(-1/sqrt(fan_in), 1/sqrt(fan_in))."""
    k1, k2, k3, k4 = jax.random.split(key, 4)
    bound1 = 1.0 / jnp.sqrt(float(D_IN))
    bound2 = 1.0 / jnp.sqrt(float(D_HID))
    # stored as [in, out]
    w1 = jax.random.uniform(k1, (D_IN, D_HID), jnp.float32, -bound1, bound1)
    b1 = jax.random.uniform(k2, (1, D_HID), jnp.float32, -bound1, bound1)
    w2 = jax.random.uniform(k3, (D_HID, D_IN), jnp.float32, -bound2, bound2)
    b2 = jax.random.uniform(k4, (1, D_IN), jnp.float32, -bound2, bound2)
    return w1, b1, w2, b2


def reference_forward(x, w1, b1, w2, b2, compute_dtype=jnp.float32):
    xc = x.astype(compute_dtype)
    w1c = w1.astype(compute_dtype)
    w2c = w2.astype(compute_dtype)
    h = jnp.dot(xc, w1c, preferred_element_type=jnp.float32) + b1.reshape(1, D_HID)
    h = jnp.maximum(h, 0.0)
    return (jnp.dot(h.astype(compute_dtype), w2c,
                    preferred_element_type=jnp.float32) + b2.reshape(1, D_IN))


if __name__ == "__main__":
    key = jax.random.PRNGKey(0)
    kx, kx2, kp = jax.random.split(key, 3)
    w1, b1, w2, b2 = init_params(kp)

    # --- default config (bf16 compute, f32 accumulation, f32 output), small batch ---
    B = 8
    x = jax.random.normal(kx, (B, D_IN), jnp.float32)
    out = jax.block_until_ready(my_ae_128_forward(x, w1, b1, w2, b2))
    assert out.shape == (B, D_IN)
    assert out.dtype == x.dtype
    ref_bf16 = reference_forward(x, w1, b1, w2, b2, compute_dtype=jnp.bfloat16)
    assert jnp.allclose(out.astype(jnp.float32), ref_bf16, atol=2e-2, rtol=2e-2), \
        "mismatch vs matched-precision (bf16) reference"
    ref_f32 = reference_forward(x, w1, b1, w2, b2)
    assert jnp.allclose(out.astype(jnp.float32), ref_f32, atol=5e-2, rtol=5e-2), \
        "mismatch vs f32 reference"

    # --- f32 compute path with ragged batch (exercises cdiv grid + padding + multi-step) ---
    B2 = 20
    x2 = jax.random.normal(kx2, (B2, D_IN), jnp.float32)
    out2 = jax.block_until_ready(
        my_ae_128_forward(x2, w1, b1, w2, b2, tm=8,
                          compute_dtype=jnp.float32, out_dtype=jnp.float32))
    assert out2.shape == (B2, D_IN)
    ref2 = reference_forward(x2, w1, b1, w2, b2)
    assert jnp.allclose(out2, ref2, atol=1e-3, rtol=1e-3), "mismatch (f32 path)"

    print("KERNEL_OK")
</pallas_src>

<mosaic_0001>
module attributes {stable_mosaic.version = 11 : i64} {
  func.func @ae_kernel(%arg0: i32, %arg1: memref<8x768xf32, #tpu.memory_space<vmem>>, %arg2: memref<768x128xf32, #tpu.memory_space<vmem>>, %arg3: memref<1x128xf32, #tpu.memory_space<vmem>>, %arg4: memref<128x768xf32, #tpu.memory_space<vmem>>, %arg5: memref<1x768xf32, #tpu.memory_space<vmem>>, %arg6: memref<8x768xf32, #tpu.memory_space<vmem>>) attributes {dimension_semantics = [#tpu.dimension_semantics<parallel>], iteration_bounds = array<i64: 1>, scalar_prefetch = 0 : i64, scratch_operands = 0 : i64, tpu.core_type = #tpu.core_type<tc>, window_params = [{transform_indices = @transform_0, window_bounds = array<i64: 8, 768>}, {pipeline_mode = #tpu.pipeline_mode<synchronous>, transform_indices = @transform_1, window_bounds = array<i64: 768, 128>}, {pipeline_mode = #tpu.pipeline_mode<synchronous>, transform_indices = @transform_2, window_bounds = array<i64: 1, 128>}, {pipeline_mode = #tpu.pipeline_mode<synchronous>, transform_indices = @transform_3, window_bounds = array<i64: 128, 768>}, {pipeline_mode = #tpu.pipeline_mode<synchronous>, transform_indices = @transform_4, window_bounds = array<i64: 1, 768>}, {transform_indices = @transform_5, window_bounds = array<i64: 8, 768>}]} {
    %c0 = arith.constant 0 : index
    %c0_0 = arith.constant 0 : index
    %0 = vector.load %arg1[%c0, %c0_0] : memref<8x768xf32, #tpu.memory_space<vmem>>, vector<8x768xf32>
    %1 = arith.truncf %0 : vector<8x768xf32> to vector<8x768xbf16>
    %c0_1 = arith.constant 0 : index
    %c0_2 = arith.constant 0 : index
    %2 = vector.load %arg2[%c0_1, %c0_2] : memref<768x128xf32, #tpu.memory_space<vmem>>, vector<768x128xf32>
    %3 = arith.truncf %2 : vector<768x128xf32> to vector<768x128xbf16>
    %cst = arith.constant dense<0.000000e+00> : vector<8x128xf32>
    %4 = tpu.matmul %1, %3, %cst {dimension_numbers = #tpu.dot_dimension_numbers<[1], [0], [0], [1], [0, 0, 1, 1], [], []>} : vector<8x768xbf16>, vector<768x128xbf16>, vector<8x128xf32> -> vector<8x128xf32>
    %c0_3 = arith.constant 0 : index
    %c0_4 = arith.constant 0 : index
    %5 = vector.load %arg3[%c0_3, %c0_4] : memref<1x128xf32, #tpu.memory_space<vmem>>, vector<1x128xf32>
    %6 = vector.broadcast %5 : vector<1x128xf32> to vector<8x128xf32>
    %7 = arith.addf %4, %6 : vector<8x128xf32>
    %cst_5 = arith.constant 0.000000e+00 : f32
    %8 = vector.broadcast %cst_5 : f32 to vector<8x128xf32>
    %9 = arith.maximumf %7, %8 : vector<8x128xf32>
    %c0_6 = arith.constant 0 : index
    %c0_7 = arith.constant 0 : index
    %10 = vector.load %arg4[%c0_6, %c0_7] : memref<128x768xf32, #tpu.memory_space<vmem>>, vector<128x768xf32>
    %11 = arith.truncf %10 : vector<128x768xf32> to vector<128x768xbf16>
    %12 = arith.truncf %9 : vector<8x128xf32> to vector<8x128xbf16>
    %cst_8 = arith.constant dense<0.000000e+00> : vector<8x768xf32>
    %13 = tpu.matmul %12, %11, %cst_8 {dimension_numbers = #tpu.dot_dimension_numbers<[1], [0], [0], [1], [0, 0, 1, 1], [], []>} : vector<8x128xbf16>, vector<128x768xbf16>, vector<8x768xf32> -> vector<8x768xf32>
    %c0_9 = arith.constant 0 : index
    %c0_10 = arith.constant 0 : index
    %14 = vector.load %arg5[%c0_9, %c0_10] : memref<1x768xf32, #tpu.memory_space<vmem>>, vector<1x768xf32>
    %15 = vector.broadcast %14 : vector<1x768xf32> to vector<8x768xf32>
    %16 = arith.addf %13, %15 : vector<8x768xf32>
    %c0_11 = arith.constant 0 : index
    %c0_12 = arith.constant 0 : index
    %17 = vector.load %arg6[%c0_11, %c0_12] : memref<8x768xf32, #tpu.memory_space<vmem>>, vector<8x768xf32>
    tpu.vector_store %arg6[%c0_11, %c0_12], %16 {strides = array<i32>} : memref<8x768xf32, #tpu.memory_space<vmem>>, vector<8x768xf32>,
    return
  }
  func.func @transform_0(%arg0: i32) -> (i32, i32) {
    %c0_i32 = arith.constant 0 : i32
    %c0_i32_0 = arith.constant 0 : i32
    return %arg0, %c0_i32 : i32, i32
  }
  func.func @transform_1(%arg0: i32) -> (i32, i32) {
    %c0_i32 = arith.constant 0 : i32
    %c0_i32_0 = arith.constant 0 : i32
    %c0_i32_1 = arith.constant 0 : i32
    return %c0_i32, %c0_i32_0 : i32, i32
  }
  func.func @transform_2(%arg0: i32) -> (i32, i32) {
    %c0_i32 = arith.constant 0 : i32
    %c0_i32_0 = arith.constant 0 : i32
    %c0_i32_1 = arith.constant 0 : i32
    return %c0_i32, %c0_i32_0 : i32, i32
  }
  func.func @transform_3(%arg0: i32) -> (i32, i32) {
    %c0_i32 = arith.constant 0 : i32
    %c0_i32_0 = arith.constant 0 : i32
    %c0_i32_1 = arith.constant 0 : i32
    return %c0_i32, %c0_i32_0 : i32, i32
  }
  func.func @transform_4(%arg0: i32) -> (i32, i32) {
    %c0_i32 = arith.constant 0 : i32
    %c0_i32_0 = arith.constant 0 : i32
    %c0_i32_1 = arith.constant 0 : i32
    return %c0_i32, %c0_i32_0 : i32, i32
  }
  func.func @transform_5(%arg0: i32) -> (i32, i32) {
    %c0_i32 = arith.constant 0 : i32
    %c0_i32_0 = arith.constant 0 : i32
    return %arg0, %c0_i32 : i32, i32
  }
}

module attributes {stable_mosaic.version = 11 : i64} {
  func.func @ae_kernel(%arg0: i32, %arg1: memref<8x768xf32, #tpu.memory_space<vmem>>, %arg2: memref<768x128xf32, #tpu.memory_space<vmem>>, %arg3: memref<1x128xf32, #tpu.memory_space<vmem>>, %arg4: memref<128x768xf32, #tpu.memory_space<vmem>>, %arg5: memref<1x768xf32, #tpu.memory_space<vmem>>, %arg6: memref<8x768xf32, #tpu.memory_space<vmem>>) attributes {dimension_semantics = [#tpu.dimension_semantics<parallel>], iteration_bounds = array<i64: 1>, scalar_prefetch = 0 : i64, scratch_operands = 0 : i64, tpu.core_type = #tpu.core_type<tc>, window_params = [{transform_indices = @transform_0, window_bounds = array<i64: 8, 768>}, {pipeline_mode = #tpu.pipeline_mode<synchronous>, transform_indices = @transform_1, window_bounds = array<i64: 768, 128>}, {pipeline_mode = #tpu.pipeline_mode<synchronous>, transform_indices = @transform_2, window_bounds = array<i64: 1, 128>}, {pipeline_mode = #tpu.pipeline_mode<synchronous>, transform_indices = @transform_3, window_bounds = array<i64: 128, 768>}, {pipeline_mode = #tpu.pipeline_mode<synchronous>, transform_indices = @transform_4, window_bounds = array<i64: 1, 768>}, {transform_indices = @transform_5, window_bounds = array<i64: 8, 768>}]} {
    %c0 = arith.constant 0 : index
    %c0_0 = arith.constant 0 : index
    %0 = vector.load %arg1[%c0, %c0_0] : memref<8x768xf32, #tpu.memory_space<vmem>>, vector<8x768xf32>
    %1 = arith.truncf %0 : vector<8x768xf32> to vector<8x768xbf16>
    %c0_1 = arith.constant 0 : index
    %c0_2 = arith.constant 0 : index
    %2 = vector.load %arg2[%c0_1, %c0_2] : memref<768x128xf32, #tpu.memory_space<vmem>>, vector<768x128xf32>
    %3 = arith.truncf %2 : vector<768x128xf32> to vector<768x128xbf16>
    %cst = arith.constant dense<0.000000e+00> : vector<8x128xf32>
    %4 = tpu.matmul %1, %3, %cst {dimension_numbers = #tpu.dot_dimension_numbers<[1], [0], [0], [1], [0, 0, 1, 1], [], []>} : vector<8x768xbf16>, vector<768x128xbf16>, vector<8x128xf32> -> vector<8x128xf32>
    %c0_3 = arith.constant 0 : index
    %c0_4 = arith.constant 0 : index
    %5 = vector.load %arg3[%c0_3, %c0_4] : memref<1x128xf32, #tpu.memory_space<vmem>>, vector<1x128xf32>
    %6 = vector.broadcast %5 : vector<1x128xf32> to vector<8x128xf32>
    %7 = arith.addf %4, %6 : vector<8x128xf32>
    %cst_5 = arith.constant 0.000000e+00 : f32
    %8 = vector.broadcast %cst_5 : f32 to vector<8x128xf32>
    %9 = arith.maximumf %7, %8 : vector<8x128xf32>
    %c0_6 = arith.constant 0 : index
    %c0_7 = arith.constant 0 : index
    %10 = vector.load %arg4[%c0_6, %c0_7] : memref<128x768xf32, #tpu.memory_space<vmem>>, vector<128x768xf32>
    %11 = arith.truncf %10 : vector<128x768xf32> to vector<128x768xbf16>
    %12 = arith.truncf %9 : vector<8x128xf32> to vector<8x128xbf16>
    %cst_8 = arith.constant dense<0.000000e+00> : vector<8x768xf32>
    %13 = tpu.matmul %12, %11, %cst_8 {dimension_numbers = #tpu.dot_dimension_numbers<[1], [0], [0], [1], [0, 0, 1, 1], [], []>} : vector<8x128xbf16>, vector<128x768xbf16>, vector<8x768xf32> -> vector<8x768xf32>
    %c0_9 = arith.constant 0 : index
    %c0_10 = arith.constant 0 : index
    %14 = vector.load %arg5[%c0_9, %c0_10] : memref<1x768xf32, #tpu.memory_space<vmem>>, vector<1x768xf32>
    %15 = vector.broadcast %14 : vector<1x768xf32> to vector<8x768xf32>
    %16 = arith.addf %13, %15 : vector<8x768xf32>
    %c0_11 = arith.constant 0 : index
    %c0_12 = arith.constant 0 : index
    %17 = vector.load %arg6[%c0_11, %c0_12] : memref<8x768xf32, #tpu.memory_space<vmem>>, vector<8x768xf32>
    tpu.vector_store %arg6[%c0_11, %c0_12], %16 {strides = array<i32>} : memref<8x768xf32, #tpu.memory_space<vmem>>, vector<8x768xf32>,
    return
  }
  func.func @transform_0(%arg0: i32) -> (i32, i32) {
    %c0_i32 = arith.constant 0 : i32
    %c0_i32_0 = arith.constant 0 : i32
    return %arg0, %c0_i32 : i32, i32
  }
  func.func @transform_1(%arg0: i32) -> (i32, i32) {
    %c0_i32 = arith.constant 0 : i32
    %c0_i32_0 = arith.constant 0 : i32
    %c0_i32_1 = arith.constant 0 : i32
    return %c0_i32, %c0_i32_0 : i32, i32
  }
  func.func @transform_2(%arg0: i32) -> (i32, i32) {
    %c0_i32 = arith.constant 0 : i32
    %c0_i32_0 = arith.constant 0 : i32
    %c0_i32_1 = arith.constant 0 : i32
    return %c0_i32, %c0_i32_0 : i32, i32
  }
  func.func @transform_3(%arg0: i32) -> (i32, i32) {
    %c0_i32 = arith.constant 0 : i32
    %c0_i32_0 = arith.constant 0 : i32
    %c0_i32_1 = arith.constant 0 : i32
    return %c0_i32, %c0_i32_0 : i32, i32
  }
  func.func @transform_4(%arg0: i32) -> (i32, i32) {
    %c0_i32 = arith.constant 0 : i32
    %c0_i32_0 = arith.constant 0 : i32
    %c0_i32_1 = arith.constant 0 : i32
    return %c0_i32, %c0_i32_0 : i32, i32
  }
  func.func @transform_5(%arg0: i32) -> (i32, i32) {
    %c0_i32 = arith.constant 0 : i32
    %c0_i32_0 = arith.constant 0 : i32
    return %arg0, %c0_i32 : i32, i32
  }
}

</mosaic_0001>

<bundles_post_ra>
// kernel: tpu_custom_call.1
= control target key start
LH: loop header
LB: loop body
LE: loop exit
PB: predicated region body
PF: predicated region fallthrough
CT: control target
= control target key end

     0   :  { %10 = vsyncpa [#allocation3], 0  ;;  %s886_s0 = inlined_call_operand.hbm [shape: f32[8,768], index: 0, kind: input, shape index: {}]   ;;  %s887_s1 = inlined_call_operand.hbm [shape: f32[768,128], index: 1, kind: input, shape index: {}]   ;;  %s888_s2 = inlined_call_operand.vmem [shape: f32[1,128], index: 2, kind: input, shape index: {}]   ;;  %s889_s3 = inlined_call_operand.hbm [shape: f32[128,768], index: 3, kind: input, shape index: {}]   ;;  %s890_s4 = inlined_call_operand.vmem [shape: f32[1,768], index: 4, kind: input, shape index: {}]   ;;  %s891_s5 = inlined_call_operand.hbm [shape: f32[8,768], index: 5, kind: output, shape index: {}]  }
   0x1   :  { %11 = vsyncpa [#allocation6], 0 }
   0x2   :  { %12 = vsyncpa [#allocation4], 0  ;;  %s829_s18 = smov [#allocation5]  }
   0x3   :  { %s28_s19 = sshll.u32 %s829_s18, 4  ;;  %s29_s19 = int_to_ptr.vmem [resolvable:$true] %s28_s19 }
   0x4   :  { %s751_s20 = scalar_lea.vmem %s29_s19, 12288  ;;  %p756_p1 = scmp.lt.s32.totalorder %s29_s19, %s29_s19 }
   0x5   :  { %p752_p0 = scmp.ne.s32.totalorder %s29_s19, %s751_s20  ;;  %p757_p2 = scmp.lt.s32.totalorder %s751_s20, %s751_s20 }
   0x7   :  { %p758_p3 = por %p757_p2, %p756_p1 }
   0x9   :  { %p759_p4 = pnand %p758_p3, %p752_p0 }
   0xb   :  { %762 = shalt.err (!%p759_p4)
}
   0xc   :  { %s830_s21 = smov 128   ;;  %s831_s22 = smov 8  }
   0xd   :  { %34 = dma.hbm_to_vmem [thread:$0]  %s887_s1, 12288, %s29_s19, [#allocation6], %s830_s21, %s830_s21, %s831_s22  }
   0xe   :  { %s832_s25 = smov [#allocation2]   ;;  %s833_s27 = smov [#allocation7]  }
   0xf   :  { %s19_s26 = sshll.u32 %s832_s25, 4  ;;  %s42_s28 = sshll.u32 %s833_s27, 4  ;;  %s20_s26 = int_to_ptr.vmem [resolvable:$true] %s19_s26  ;;  %s43_s28 = int_to_ptr.vmem [resolvable:$true] %s42_s28 }
  0x10   :  { %s771_s29 = scalar_lea.vmem %s20_s26, 768  ;;  %p776_p6 = scmp.lt.s32.totalorder %s20_s26, %s20_s26 }
  0x11   :  { %p772_p5 = scmp.ne.s32.totalorder %s20_s26, %s771_s29  ;;  %p777_p7 = scmp.lt.s32.totalorder %s771_s29, %s771_s29 }
  0x13   :  { %p778_p8 = por %p777_p7, %p776_p6 }
  0x15   :  { %p779_p9 = pnand %p778_p8, %p772_p5 }
  0x17   :  { %782 = shalt.err (!%p779_p9)
}
  0x18   :  { %22 = dma.hbm_to_vmem [thread:$0]  %s886_s0, 768, %s20_s26, [#allocation3]  }
  0x19   :  { %s791_s7 = scalar_lea.vmem %s43_s28, 12288  ;;  %p796_p11 = scmp.lt.s32.totalorder %s43_s28, %s43_s28 }
  0x1a   :  { %p792_p10 = scmp.ne.s32.totalorder %s43_s28, %s791_s7  ;;  %p797_p12 = scmp.lt.s32.totalorder %s791_s7, %s791_s7 }
  0x1c   :  { %p798_p13 = por %p797_p12, %p796_p11 }
  0x1e   :  { %p799_p0 = pnand %p798_p13, %p792_p10 }
  0x20   :  { %802 = shalt.err (!%p799_p0)
}
  0x21   :  { %s834_s1 = smov 768   ;;  %s835_s8 = smov 48  }
  0x22   :  { %48 = dma.hbm_to_vmem [thread:$0]  %s889_s3, 12288, %s43_s28, [#allocation6], %s834_s1, %s834_s1, %s835_s8  }
  0x23   :  { %823 = dma.done.wait [#allocation3], 768  }
  0x24   :  { %824 = vsyncadd [#allocation3], 4294966528 }
  0x25   :  { %825 = dma.done.wait [#allocation6], 24576  }
  0x26   :  { %826 = vsyncadd [#allocation6], 4294942720  ;;  %v103_v0 = vld [vmem:[#allocation5 + $0xf0] sm:$0xff]  ;;  %v104_v1 = vld [vmem:[#allocation5 + $0xf8] sm:$0xff] }
  0x27   :  { %v87_v2 = vld [vmem:[#allocation5 + $0x70] sm:$0xff]  ;;  %v184_v3 = vpack.c.bf16 %v104_v1, %v103_v0  ;;  %v88_v4 = vld [vmem:[#allocation5 + $0x78] sm:$0xff]  ;;  %v101_v11 = vld [vmem:[#allocation5 + $0xe0] sm:$0xff] }
  0x28   :  { %v135_v5 = vld [vmem:[#allocation5 + $0x1f0] sm:$0xff]  ;;  %v136_v6 = vld [vmem:[#allocation5 + $0x1f8] sm:$0xff]  ;;  %v176_v7 = vpack.c.bf16 %v88_v4, %v87_v2  ;;  %v102_v13 = vld [vmem:[#allocation5 + $0xe8] sm:$0xff] }
  0x29   :  { %v200_v8 = vpack.c.bf16 %v136_v6, %v135_v5  ;;  %v119_v9 = vld [vmem:[#allocation5 + $0x170] sm:$0xff]  ;;  %v120_v10 = vld [vmem:[#allocation5 + $0x178] sm:$0xff]  ;;  %668 = vmatprep.subr.bf16.mxu0 %v184_v3  ;;  %v85_v14 = vld [vmem:[#allocation5 + $0x60] sm:$0xff]  ;;  %v183_v16 = vpack.c.bf16 %v102_v13, %v101_v11 }
  0x2a   :  { %v192_v12 = vpack.c.bf16 %v120_v10, %v119_v9  ;;  %v86_v15 = vld [vmem:[#allocation5 + $0x68] sm:$0xff]  ;;  %669 = vmatpush3.bf16.msra.mxu0 %v176_v7  ;;  %v133_v18 = vld [vmem:[#allocation5 + $0x1e0] sm:$0xff]  ;;  %v99_v23 = vld [vmem:[#allocation5 + $0xd0] sm:$0xff] }
  0x2b   :  { %690 = vmatprep.subr.bf16.mxu1 %v200_v8  ;;  %v175_v17 = vpack.c.bf16 %v86_v15, %v85_v14  ;;  %v134_v19 = vld [vmem:[#allocation5 + $0x1e8] sm:$0xff]  ;;  %v117_v20 = vld [vmem:[#allocation5 + $0x160] sm:$0xff]  ;;  %v100_v24 = vld [vmem:[#allocation5 + $0xd8] sm:$0xff]  ;;  %670 = vmatprep.subr.bf16.mxu0 %v183_v16 }
  0x2c   :  { %691 = vmatpush3.bf16.msra.mxu1 %v192_v12  ;;  %v199_v21 = vpack.c.bf16 %v134_v19, %v133_v18  ;;  %v118_v22 = vld [vmem:[#allocation5 + $0x168] sm:$0xff]  ;;  %v182_v26 = vpack.c.bf16 %v100_v24, %v99_v23  ;;  %v83_v27 = vld [vmem:[#allocation5 + $0x50] sm:$0xff]  ;;  %v84_v28 = vld [vmem:[#allocation5 + $0x58] sm:$0xff] }
  0x2d   :  { %v191_v25 = vpack.c.bf16 %v118_v22, %v117_v20  ;;  %v131_v29 = vld [vmem:[#allocation5 + $0x1d0] sm:$0xff]  ;;  %v132_v30 = vld [vmem:[#allocation5 + $0x1d8] sm:$0xff]  ;;  %v174_v33 = vpack.c.bf16 %v84_v28, %v83_v27  ;;  %v97_v35 = vld [vmem:[#allocation5 + $0xc0] sm:$0xff] }
  0x2e   :  { %692 = vmatprep.subr.bf16.mxu1 %v199_v21  ;;  %v115_v31 = vld [vmem:[#allocation5 + $0x150] sm:$0xff]  ;;  %v116_v32 = vld [vmem:[#allocation5 + $0x158] sm:$0xff]  ;;  %671 = vmatpush3.bf16.msra.mxu0 %v175_v17  ;;  %v198_v34 = vpack.c.bf16 %v132_v30, %v131_v29  ;;  %v98_v36 = vld [vmem:[#allocation5 + $0xc8] sm:$0xff] }
  0x2f   :  { %v81_v37 = vld [vmem:[#allocation5 + $0x40] sm:$0xff]  ;;  %672 = vmatprep.subr.bf16.mxu0 %v182_v26  ;;  %v190_v38 = vpack.c.bf16 %v116_v32, %v115_v31  ;;  %v181_v39 = vpack.c.bf16 %v98_v36, %v97_v35  ;;  %v82_v40 = vld [vmem:[#allocation5 + $0x48] sm:$0xff]  ;;  %v95_v46 = vld [vmem:[#allocation5 + $0xb0] sm:$0xff] }
  0x30   :  { %693 = vmatpush3.bf16.msra.mxu1 %v191_v25  ;;  %v129_v41 = vld [vmem:[#allocation5 + $0x1c0] sm:$0xff]  ;;  %v130_v42 = vld [vmem:[#allocation5 + $0x1c8] sm:$0xff]  ;;  %v96_v47 = vld [vmem:[#allocation5 + $0xb8] sm:$0xff]  ;;  %v173_v48 = vpack.c.bf16 %v82_v40, %v81_v37 }
  0x31   :  { %694 = vmatprep.subr.bf16.mxu1 %v198_v34  ;;  %v197_v43 = vpack.c.bf16 %v130_v42, %v129_v41  ;;  %v113_v44 = vld [vmem:[#allocation5 + $0x140] sm:$0xff]  ;;  %v114_v45 = vld [vmem:[#allocation5 + $0x148] sm:$0xff]  ;;  %v127_v49 = vld [vmem:[#allocation5 + $0x1b0] sm:$0xff]  ;;  %v180_v52 = vpack.c.bf16 %v96_v47, %v95_v46 }
  0x32   :  { %673 = vmatpush3.bf16.msra.mxu0 %v174_v33  ;;  %v128_v50 = vld [vmem:[#allocation5 + $0x1b8] sm:$0xff]  ;;  %v189_v51 = vpack.c.bf16 %v114_v45, %v113_v44  ;;  %v79_v53 = vld [vmem:[#allocation5 + $0x30] sm:$0xff]  ;;  %v93_v58 = vld [vmem:[#allocation5 + $0xa0] sm:$0xff] }
  0x33   :  { %674 = vmatprep.subr.bf16.mxu0 %v181_v39  ;;  %v80_v54 = vld [vmem:[#allocation5 + $0x38] sm:$0xff]  ;;  %v111_v55 = vld [vmem:[#allocation5 + $0x130] sm:$0xff]  ;;  %v196_v56 = vpack.c.bf16 %v128_v50, %v127_v49  ;;  %v94_v59 = vld [vmem:[#allocation5 + $0xa8] sm:$0xff] }
  0x34   :  { %695 = vmatpush3.bf16.msra.mxu1 %v190_v38  ;;  %v112_v57 = vld [vmem:[#allocation5 + $0x138] sm:$0xff]  ;;  %v125_v60 = vld [vmem:[#allocation5 + $0x1a0] sm:$0xff]  ;;  %v126_v61 = vld [vmem:[#allocation5 + $0x1a8] sm:$0xff]  ;;  %v172_v62 = vpack.c.bf16 %v80_v54, %v79_v53  ;;  %v179_v0 = vpack.c.bf16 %v94_v59, %v93_v58 }
  0x35   :  { %696 = vmatprep.subr.bf16.mxu1 %v197_v43  ;;  %v188_v63 = vpack.c.bf16 %v112_v57, %v111_v55  ;;  %v77_v1 = vld [vmem:[#allocation5 + $0x20] sm:$0xff]  ;;  %v78_v2 = vld [vmem:[#allocation5 + $0x28] sm:$0xff]  ;;  %v195_v4 = vpack.c.bf16 %v126_v61, %v125_v60  ;;  %v91_v6 = vld [vmem:[#allocation5 + $0x90] sm:$0xff] }
  0x36   :  { %675 = vmatpush3.bf16.msra.mxu0 %v173_v48  ;;  %v109_v3 = vld [vmem:[#allocation5 + $0x120] sm:$0xff]  ;;  %v110_v5 = vld [vmem:[#allocation5 + $0x128] sm:$0xff]  ;;  %v92_v7 = vld [vmem:[#allocation5 + $0x98] sm:$0xff]  ;;  %v171_v10 = vpack.c.bf16 %v78_v2, %v77_v1 }
  0x37   :  { %676 = vmatprep.subr.bf16.mxu0 %v180_v52  ;;  %v123_v8 = vld [vmem:[#allocation5 + $0x190] sm:$0xff]  ;;  %v124_v9 = vld [vmem:[#allocation5 + $0x198] sm:$0xff]  ;;  %v187_v13 = vpack.c.bf16 %v110_v5, %v109_v3  ;;  %v178_v14 = vpack.c.bf16 %v92_v7, %v91_v6  ;;  %v89_v20 = vld [vmem:[#allocation5 + $0x80] sm:$0xff] }
  0x38   :  { %697 = vmatpush3.bf16.msra.mxu1 %v189_v51  ;;  %v75_v11 = vld [vmem:[#allocation5 + $0x10] sm:$0xff]  ;;  %v62_v12 = vld [vmem:[#allocation2 + $0x8] sm:$0xff]  ;;  %v194_v19 = vpack.c.bf16 %v124_v9, %v123_v8  ;;  %v90_v21 = vld [vmem:[#allocation5 + $0x88] sm:$0xff] }
  0x39   :  { %698 = vmatprep.subr.bf16.mxu1 %v196_v56  ;;  %v76_v15 = vld [vmem:[#allocation5 + $0x18] sm:$0xff]  ;;  %v107_v16 = vld [vmem:[#allocation5 + $0x110] sm:$0xff]  ;;  %v68_v18 = vpack.c.bf16 %v62_v12, %v62_v12  ;;  %v64_v22 = vld [vmem:[#allocation2 + $0x18] sm:$0xff]  ;;  %v177_v28 = vpack.c.bf16 %v90_v21, %v89_v20 }
  0x3a   :  { %677 = vmatpush3.bf16.msra.mxu0 %v172_v62  ;;  %v108_v17 = vld [vmem:[#allocation5 + $0x118] sm:$0xff]  ;;  %v121_v23 = vld [vmem:[#allocation5 + $0x180] sm:$0xff]  ;;  %v122_v24 = vld [vmem:[#allocation5 + $0x188] sm:$0xff]  ;;  %v70_v25 = vpack.c.bf16 %v64_v22, %v64_v22  ;;  %v170_v26 = vpack.c.bf16 %v76_v15, %v75_v11 }
  0x3b   :  { %678 = vmatprep.subr.bf16.mxu0 %v179_v0  ;;  %256 = vmatprep.mubr.bf16.mxu0 %v68_v18  ;;  %v186_v27 = vpack.c.bf16 %v108_v17, %v107_v16  ;;  %v73_v29 = vld [vmem:[#allocation5] sm:$0xff]  ;;  %v74_v30 = vld [vmem:[#allocation5 + $0x8] sm:$0xff]  ;;  %v193_v32 = vpack.c.bf16 %v122_v24, %v121_v23  ;;  %v167_v34 = vld [vmem:[#allocation5 + $0x2f0] sm:$0xff] }
  0x3c   :  { %699 = vmatpush3.bf16.msra.mxu1 %v188_v63  ;;  %v105_v31 = vld [vmem:[#allocation5 + $0x100] sm:$0xff]  ;;  %v106_v33 = vld [vmem:[#allocation5 + $0x108] sm:$0xff]  ;;  %v168_v35 = vld [vmem:[#allocation5 + $0x2f8] sm:$0xff]  ;;  %296 = vmatprep.mubr.bf16.mxu1 %v70_v25  ;;  %v169_v36 = vpack.c.bf16 %v74_v30, %v73_v29 }
  0x3d   :  { %700 = vmatprep.subr.bf16.mxu1 %v195_v4  ;;  %v61_v37 = vld [vmem:[#allocation2] sm:$0xff]  ;;  %v185_v38 = vpack.c.bf16 %v106_v33, %v105_v31  ;;  %v216_v39 = vpack.c.bf16 %v168_v35, %v167_v34  ;;  %v152_v41 = vld [vmem:[#allocation5 + $0x278] sm:$0xff]  ;;  %v63_v42 = vld [vmem:[#allocation2 + $0x10] sm:$0xff] }
  0x3e   :  { %679 = vmatpush3.bf16.msra.mxu0 %v171_v10  ;;  %v151_v40 = vld [vmem:[#allocation5 + $0x270] sm:$0xff]  ;;  %v165_v43 = vld [vmem:[#allocation5 + $0x2e0] sm:$0xff]  ;;  %v166_v44 = vld [vmem:[#allocation5 + $0x2e8] sm:$0xff]  ;;  %v67_v45 = vpack.c.bf16 %v61_v37, %v61_v37  ;;  %v69_v47 = vpack.c.bf16 %v63_v42, %v63_v42 }
  0x3f   :  { %680 = vmatprep.subr.bf16.mxu0 %v178_v14  ;;  %v208_v46 = vpack.c.bf16 %v152_v41, %v151_v40  ;;  %v215_v48 = vpack.c.bf16 %v166_v44, %v165_v43  ;;  %v149_v49 = vld [vmem:[#allocation5 + $0x260] sm:$0xff]  ;;  %v150_v50 = vld [vmem:[#allocation5 + $0x268] sm:$0xff]  ;;  %v66_v51 = vld [vmem:[#allocation2 + $0x28] sm:$0xff] }
  0x40   :  { %701 = vmatpush3.bf16.msra.mxu1 %v187_v13  ;;  %v163_v52 = vld [vmem:[#allocation5 + $0x2d0] sm:$0xff]  ;;  %v164_v53 = vld [vmem:[#allocation5 + $0x2d8] sm:$0xff]  ;;  %v72_v54 = vpack.c.bf16 %v66_v51, %v66_v51  ;;  %v207_v55 = vpack.c.bf16 %v150_v50, %v149_v49  ;;  %v161_v59 = vld [vmem:[#allocation5 + $0x2c0] sm:$0xff] }
  0x41   :  { %702 = vmatprep.subr.bf16.mxu1 %v194_v19  ;;  %v214_v56 = vpack.c.bf16 %v164_v53, %v163_v52  ;;  %v147_v57 = vld [vmem:[#allocation5 + $0x250] sm:$0xff]  ;;  %v148_v58 = vld [vmem:[#allocation5 + $0x258] sm:$0xff]  ;;  %v162_v60 = vld [vmem:[#allocation5 + $0x2c8] sm:$0xff] }
  0x42   :  { %681 = vmatpush3.bf16.msra.mxu0 %v170_v26  ;;  %v206_v61 = vpack.c.bf16 %v148_v58, %v147_v57  ;;  %v213_v62 = vpack.c.bf16 %v162_v60, %v161_v59  ;;  %v145_v63 = vld [vmem:[#allocation5 + $0x240] sm:$0xff]  ;;  %v146_v0 = vld [vmem:[#allocation5 + $0x248] sm:$0xff]  ;;  %v159_v1 = vld [vmem:[#allocation5 + $0x2b0] sm:$0xff] }
  0x43   :  { %682 = vmatprep.subr.bf16.mxu0 %v177_v28  ;;  %v160_v2 = vld [vmem:[#allocation5 + $0x2b8] sm:$0xff]  ;;  %v205_v3 = vpack.c.bf16 %v146_v0, %v145_v63  ;;  %v143_v5 = vld [vmem:[#allocation5 + $0x230] sm:$0xff]  ;;  %v157_v7 = vld [vmem:[#allocation5 + $0x2a0] sm:$0xff] }
  0x44   :  { %703 = vmatpush3.bf16.msra.mxu1 %v186_v27  ;;  %v212_v4 = vpack.c.bf16 %v160_v2, %v159_v1  ;;  %v144_v6 = vld [vmem:[#allocation5 + $0x238] sm:$0xff]  ;;  %v158_v8 = vld [vmem:[#allocation5 + $0x2a8] sm:$0xff]  ;;  %v141_v11 = vld [vmem:[#allocation5 + $0x220] sm:$0xff] }
  0x45   :  { %704 = vmatprep.subr.bf16.mxu1 %v193_v32  ;;  %v204_v9 = vpack.c.bf16 %v144_v6, %v143_v5  ;;  %v211_v10 = vpack.c.bf16 %v158_v8, %v157_v7  ;;  %v142_v12 = vld [vmem:[#allocation5 + $0x228] sm:$0xff]  ;;  %v155_v13 = vld [vmem:[#allocation5 + $0x290] sm:$0xff]  ;;  %v156_v14 = vld [vmem:[#allocation5 + $0x298] sm:$0xff] }
  0x46   :  { %683 = vmatpush3.bf16.msra.mxu0 %v169_v36  ;;  %v203_v15 = vpack.c.bf16 %v142_v12, %v141_v11  ;;  %v210_v16 = vpack.c.bf16 %v156_v14, %v155_v13  ;;  %v139_v17 = vld [vmem:[#allocation5 + $0x210] sm:$0xff]  ;;  %v140_v18 = vld [vmem:[#allocation5 + $0x218] sm:$0xff]  ;;  %v153_v19 = vld [vmem:[#allocation5 + $0x280] sm:$0xff] }
  0x47   :  { %712 = vmatprep.subr.bf16.mxu0 %v216_v39  ;;  %v154_v20 = vld [vmem:[#allocation5 + $0x288] sm:$0xff]  ;;  %v202_v21 = vpack.c.bf16 %v140_v18, %v139_v17  ;;  %v137_v23 = vld [vmem:[#allocation5 + $0x200] sm:$0xff]  ;;  %v65_v26 = vld [vmem:[#allocation2 + $0x20] sm:$0xff] }
  0x48   :  { %705 = vmatpush3.bf16.msra.mxu1 %v185_v38  ;;  %v209_v22 = vpack.c.bf16 %v154_v20, %v153_v19  ;;  %v138_v24 = vld [vmem:[#allocation5 + $0x208] sm:$0xff]  ;;  %v71_v27 = vpack.c.bf16 %v65_v26, %v65_v26  ;;  %v436_v29 = vld [vmem:[#allocation7 + $0x2d8] sm:$0xff]  ;;  %v429_v30 = vld [vmem:[#allocation7 + $0x2a0] sm:$0xff] }
  0x49   :  { %257 = vmatmul.mubr.bf16.vlgmr.msra.gmra.mxu0 %v67_v45  ;;  %v201_v25 = vpack.c.bf16 %v138_v24, %v137_v23  ;;  %v430_v28 = vld [vmem:[#allocation7 + $0x2a8] sm:$0xff]  ;;  %v435_v32 = vld [vmem:[#allocation7 + $0x2d0] sm:$0xff]  ;;  %v432_v33 = vld [vmem:[#allocation7 + $0x2b8] sm:$0xff] }
  0x4a   :  { %713 = vmatpush3.bf16.msra.mxu0 %v208_v46  ;;  %336 = vmatprep.mubr.bf16.mxu0 %v72_v54  ;;  %v484_v31 = vpack.c.bf16 %v436_v29, %v430_v28  ;;  %v438_v34 = vld [vmem:[#allocation7 + $0x2e8] sm:$0xff]  ;;  %v483_v35 = vpack.c.bf16 %v435_v32, %v429_v30  ;;  %v431_v37 = vld [vmem:[#allocation7 + $0x2b0] sm:$0xff]  ;;  %v437_v38 = vld [vmem:[#allocation7 + $0x2e0] sm:$0xff] }
  0x4b   :  { %297 = vmatmul.mubr.bf16.vlgmr.msra.gmra.mxu1 %v69_v47  ;;  %714 = vmatprep.subr.bf16.mxu0 %v215_v48  ;;  %v486_v36 = vpack.c.bf16 %v438_v34, %v432_v33  ;;  %v418_v39 = vld [vmem:[#allocation7 + $0x248] sm:$0xff]  ;;  %v485_v40 = vpack.c.bf16 %v437_v38, %v431_v37  ;;  %v424_v41 = vld [vmem:[#allocation7 + $0x278] sm:$0xff]  ;;  %v417_v42 = vld [vmem:[#allocation7 + $0x240] sm:$0xff] }
  0x4c   :  { %522 = vmatprep.subr.bf16.mxu1 %v484_v31  ;;  %v423_v43 = vld [vmem:[#allocation7 + $0x270] sm:$0xff]  ;;  %v478_v44 = vpack.c.bf16 %v424_v41, %v418_v39  ;;  %v420_v46 = vld [vmem:[#allocation7 + $0x258] sm:$0xff]  ;;  %v426_v47 = vld [vmem:[#allocation7 + $0x288] sm:$0xff] }
  0x4d   :  { %523 = vmatpush1.bf16.msra.mxu1 %v483_v35  ;;  %v477_v45 = vpack.c.bf16 %v423_v43, %v417_v42  ;;  %v419_v48 = vld [vmem:[#allocation7 + $0x250] sm:$0xff]  ;;  %v480_v49 = vpack.c.bf16 %v426_v47, %v420_v46  ;;  %v425_v50 = vld [vmem:[#allocation7 + $0x280] sm:$0xff]  ;;  %v406_v51 = vld [vmem:[#allocation7 + $0x1e8] sm:$0xff] }
  0x4e   :  { %715 = vmatpush3.bf16.msra.mxu0 %v207_v55  ;;  %v412_v52 = vld [vmem:[#allocation7 + $0x218] sm:$0xff]  ;;  %524 = vmatprep.subr.bf16.mxu1 %v478_v44  ;;  %v479_v53 = vpack.c.bf16 %v425_v50, %v419_v48  ;;  %v405_v55 = vld [vmem:[#allocation7 + $0x1e0] sm:$0xff]  ;;  %v414_v58 = vld [vmem:[#allocation7 + $0x228] sm:$0xff] }
  0x4f   :  { %716 = vmatprep.subr.bf16.mxu0 %v214_v56  ;;  %v472_v54 = vpack.c.bf16 %v412_v52, %v406_v51  ;;  %v411_v56 = vld [vmem:[#allocation7 + $0x210] sm:$0xff]  ;;  %v408_v57 = vld [vmem:[#allocation7 + $0x1f8] sm:$0xff]  ;;  %v413_v60 = vld [vmem:[#allocation7 + $0x220] sm:$0xff] }
  0x50   :  { %v407_v59 = vld [vmem:[#allocation7 + $0x1f0] sm:$0xff]  ;;  %v394_v63 = vld [vmem:[#allocation7 + $0x188] sm:$0xff]  ;;  %v400_v0 = vld [vmem:[#allocation7 + $0x1b8] sm:$0xff] }
  0x51   :  { %525 = vmatpush1.bf16.msra.mxu1 %v477_v45  ;;  %v393_v1 = vld [vmem:[#allocation7 + $0x180] sm:$0xff]  ;;  %v473_v2 = vpack.c.bf16 %v413_v60, %v407_v59  ;;  %v396_v5 = vld [vmem:[#allocation7 + $0x198] sm:$0xff]  ;;  %v402_v6 = vld [vmem:[#allocation7 + $0x1c8] sm:$0xff] }
  0x52   :  { %717 = vmatpush3.bf16.msra.mxu0 %v206_v61  ;;  %v471_v61 = vpack.c.bf16 %v411_v56, %v405_v55  ;;  %526 = vmatprep.subr.bf16.mxu1 %v472_v54  ;;  %v468_v7 = vpack.c.bf16 %v402_v6, %v396_v5  ;;  %v395_v8 = vld [vmem:[#allocation7 + $0x190] sm:$0xff]  ;;  %v388_v11 = vld [vmem:[#allocation7 + $0x158] sm:$0xff]  ;;  %v390_v14 = vld [vmem:[#allocation7 + $0x168] sm:$0xff] }
  0x53   :  { %718 = vmatprep.subr.bf16.mxu0 %v213_v62  ;;  %v474_v62 = vpack.c.bf16 %v414_v58, %v408_v57  ;;  %v384_v13 = vld [vmem:[#allocation7 + $0x138] sm:$0xff]  ;;  %v381_v17 = vld [vmem:[#allocation7 + $0x120] sm:$0xff]  ;;  %v387_v18 = vld [vmem:[#allocation7 + $0x150] sm:$0xff] }
  0x54   :  { %v383_v19 = vld [vmem:[#allocation7 + $0x130] sm:$0xff]  ;;  %v462_v20 = vpack.c.bf16 %v390_v14, %v384_v13  ;;  %v376_v23 = vld [vmem:[#allocation7 + $0xf8] sm:$0xff]  ;;  %v459_v26 = vpack.c.bf16 %v387_v18, %v381_v17  ;;  %v369_v29 = vld [vmem:[#allocation7 + $0xc0] sm:$0xff] }
  0x55   :  { %527 = vmatpush1.bf16.msra.mxu1 %v471_v61  ;;  %v372_v24 = vld [vmem:[#allocation7 + $0xd8] sm:$0xff]  ;;  %v375_v30 = vld [vmem:[#allocation7 + $0xf0] sm:$0xff]  ;;  %v377_v34 = vld [vmem:[#allocation7 + $0x100] sm:$0xff] }
  0x56   :  { %719 = vmatpush3.bf16.msra.mxu0 %v205_v3  ;;  %v466_v3 = vpack.c.bf16 %v400_v0, %v394_v63  ;;  %v453_v32 = vpack.c.bf16 %v375_v30, %v369_v29  ;;  %v371_v33 = vld [vmem:[#allocation7 + $0xd0] sm:$0xff]  ;;  %v364_v37 = vld [vmem:[#allocation7 + $0x98] sm:$0xff]  ;;  %v357_v39 = vld [vmem:[#allocation7 + $0x60] sm:$0xff]  ;;  %v836_v63 = vmov 0  }
  0x57   :  { %720 = vmatprep.subr.bf16.mxu0 %v212_v4  ;;  %v399_v4 = vld [vmem:[#allocation7 + $0x1b0] sm:$0xff]  ;;  %v455_v35 = vpack.c.bf16 %v377_v34, %v371_v33  ;;  %v360_v41 = vld [vmem:[#allocation7 + $0x78] sm:$0xff]  ;;  %v366_v43 = vld [vmem:[#allocation7 + $0xa8] sm:$0xff]  ;;  %554 = vmatprep.mubr.bf16.mxu1 %v836_v63 }
  0x58   :  { %v465_v12 = vpack.c.bf16 %v399_v4, %v393_v1  ;;  %528 = vmatprep.subr.bf16.mxu1 %v466_v3  ;;  %v359_v44 = vld [vmem:[#allocation7 + $0x70] sm:$0xff]  ;;  %v365_v45 = vld [vmem:[#allocation7 + $0xa0] sm:$0xff]  ;;  %v450_v46 = vpack.c.bf16 %v366_v43, %v360_v41  ;;  %v346_v48 = vld [vmem:[#allocation7 + $0x8] sm:$0xff] }
  0x59   :  { %v449_v47 = vpack.c.bf16 %v365_v45, %v359_v44  ;;  %v345_v51 = vld [vmem:[#allocation7] sm:$0xff]  ;;  %v351_v52 = vld [vmem:[#allocation7 + $0x30] sm:$0xff]  ;;  %v354_v55 = vld [vmem:[#allocation7 + $0x48] sm:$0xff] }
  0x5a   :  { %721 = vmatpush3.bf16.msra.mxu0 %v204_v9  ;;  %v401_v9 = vld [vmem:[#allocation7 + $0x1c0] sm:$0xff]  ;;  %529 = vmatpush1.bf16.msra.mxu1 %v465_v12  ;;  %v441_v54 = vpack.c.bf16 %v351_v52, %v345_v51  ;;  %v347_v56 = vld [vmem:[#allocation7 + $0x10] sm:$0xff]  ;;  %v434_v60 = vld [vmem:[#allocation7 + $0x2c8] sm:$0xff] }
  0x5b   :  { %722 = vmatprep.subr.bf16.mxu0 %v211_v10  ;;  %v382_v10 = vld [vmem:[#allocation7 + $0x128] sm:$0xff]  ;;  %v353_v57 = vld [vmem:[#allocation7 + $0x40] sm:$0xff]  ;;  %v440_v61 = vld [vmem:[#allocation7 + $0x2f8] sm:$0xff] }
  0x5c   :  { %v443_v59 = vpack.c.bf16 %v353_v57, %v347_v56  ;;  %v433_v18 = vld [vmem:[#allocation7 + $0x2c0] sm:$0xff]  ;;  %v410_v29 = vld [vmem:[#allocation7 + $0x208] sm:$0xff]  ;;  %v416_v30 = vld [vmem:[#allocation7 + $0x238] sm:$0xff] }
  0x5d   :  { %v409_v33 = vld [vmem:[#allocation7 + $0x200] sm:$0xff]  ;;  %v415_v34 = vld [vmem:[#allocation7 + $0x230] sm:$0xff]  ;;  %v386_v41 = vld [vmem:[#allocation7 + $0x148] sm:$0xff] }
  0x5e   :  { %723 = vmatpush3.bf16.msra.mxu0 %v203_v15  ;;  %v467_v15 = vpack.c.bf16 %v401_v9, %v395_v8  ;;  %v667_v9 = vld [vmem:[%s888_s2] ss:$0 sm:$0xff]  ;;  %v385_v45 = vld [vmem:[#allocation7 + $0x140] sm:$0xff] }
  0x5f   :  { %724 = vmatprep.subr.bf16.mxu0 %v210_v16  ;;  %v460_v16 = vpack.c.bf16 %v388_v11, %v382_v10  ;;  %v373_v51 = vld [vmem:[#allocation7 + $0xe0] sm:$0xff]  ;;  %v379_v52 = vld [vmem:[#allocation7 + $0x110] sm:$0xff] }
  0x60   :  { %v361_v57 = vld [vmem:[#allocation7 + $0x80] sm:$0xff] }
  0x61   :  { %530 = vmatprep.subr.bf16.mxu1 %v460_v16 }
  0x62   :  { %725 = vmatpush3.bf16.msra.mxu0 %v202_v21  ;;  %v389_v21 = vld [vmem:[#allocation7 + $0x160] sm:$0xff]  ;;  %531 = vmatpush1.bf16.msra.mxu1 %v459_v26 }
  0x63   :  { %726 = vmatprep.subr.bf16.mxu0 %v209_v22  ;;  %v370_v22 = vld [vmem:[#allocation7 + $0xc8] sm:$0xff] }
  0x64   :  { %v454_v28 = vpack.c.bf16 %v376_v23, %v370_v22  ;;  %v428_v22 = vld [vmem:[#allocation7 + $0x298] sm:$0xff] }
  0x66   :  { %727 = vmatpush3.bf16.msra.mxu0 %v201_v25  ;;  %v378_v25 = vld [vmem:[#allocation7 + $0x108] sm:$0xff]  ;;  %532 = vmatprep.subr.bf16.mxu1 %v454_v28  ;;  %v427_v28 = vld [vmem:[#allocation7 + $0x290] sm:$0xff] }
  0x67   :  { %563 = vmatprep.subr.bf16.mxu0 %v486_v36  ;;  %v456_v31 = vpack.c.bf16 %v378_v25, %v372_v24  ;;  %533 = vmatpush1.bf16.msra.mxu1 %v453_v32  ;;  %v358_v36 = vld [vmem:[#allocation7 + $0x68] sm:$0xff]  ;;  %v476_v32 = vpack.c.bf16 %v416_v30, %v410_v29 }
  0x68   :  { %v448_v38 = vpack.c.bf16 %v364_v37, %v358_v36  ;;  %v404_v36 = vld [vmem:[#allocation7 + $0x1d8] sm:$0xff]  ;;  %v475_v37 = vpack.c.bf16 %v415_v34, %v409_v33 }
  0x69   :  { %337 = vmatmul.mubr.bf16.vlgmr.msra.gmra.mxu0 %v71_v27  ;;  %v461_v27 = vpack.c.bf16 %v389_v21, %v383_v19  ;;  %v439_v19 = vld [vmem:[#allocation7 + $0x2f0] sm:$0xff]  ;;  %v422_v21 = vld [vmem:[#allocation7 + $0x268] sm:$0xff] }
  0x6a   :  { %564 = vmatpush1.bf16.msra.mxu0 %v485_v40  ;;  %v363_v40 = vld [vmem:[#allocation7 + $0x90] sm:$0xff]  ;;  %534 = vmatprep.subr.bf16.mxu1 %v448_v38  ;;  %v487_v24 = vpack.c.bf16 %v439_v19, %v433_v18  ;;  %v482_v26 = vpack.c.bf16 %v428_v22, %v422_v21 }
  0x6b   :  { %565 = vmatprep.subr.bf16.mxu0 %v480_v49  ;;  %v447_v42 = vpack.c.bf16 %v363_v40, %v357_v39  ;;  %v352_v49 = vld [vmem:[#allocation7 + $0x38] sm:$0xff]  ;;  %595 = vmatprep.mubr.bf16.mxu0 %v836_v63  ;;  %v397_v39 = vld [vmem:[#allocation7 + $0x1a0] sm:$0xff]  ;;  %v403_v40 = vld [vmem:[#allocation7 + $0x1d0] sm:$0xff] }
  0x6c   :  { %v442_v50 = vpack.c.bf16 %v352_v49, %v346_v48  ;;  %v469_v43 = vpack.c.bf16 %v403_v40, %v397_v39  ;;  %v380_v48 = vld [vmem:[#allocation7 + $0x118] sm:$0xff] }
  0x6d   :  { %535 = vmatpush1.bf16.msra.mxu1 %v447_v42  ;;  %v392_v42 = vld [vmem:[#allocation7 + $0x178] sm:$0xff] }
  0x6e   :  { %566 = vmatpush1.bf16.msra.mxu0 %v479_v53  ;;  %v348_v53 = vld [vmem:[#allocation7 + $0x18] sm:$0xff]  ;;  %536 = vmatprep.subr.bf16.mxu1 %v442_v50  ;;  %v464_v44 = vpack.c.bf16 %v392_v42, %v386_v41 }
  0x6f   :  { %567 = vmatprep.subr.bf16.mxu0 %v474_v62  ;;  %v444_v58 = vpack.c.bf16 %v354_v55, %v348_v53  ;;  %v488_v62 = vpack.c.bf16 %v440_v61, %v434_v60  ;;  %v362_v53 = vld [vmem:[#allocation7 + $0x88] sm:$0xff]  ;;  %v457_v55 = vpack.c.bf16 %v379_v52, %v373_v51  ;;  %v356_v60 = vld [vmem:[#allocation7 + $0x58] sm:$0xff] }
  0x71   :  { %537 = vmatpush1.bf16.msra.mxu1 %v441_v54  ;;  %v368_v54 = vld [vmem:[#allocation7 + $0xb8] sm:$0xff] }
  0x72   :  { %568 = vmatpush1.bf16.msra.mxu0 %v473_v2  ;;  %604 = vmatprep.subr.bf16.mxu1 %v488_v62  ;;  %v452_v56 = vpack.c.bf16 %v368_v54, %v362_v53 }
  0x73   :  { %569 = vmatprep.subr.bf16.mxu0 %v468_v7 }
  0x76   :  { %570 = vmatpush1.bf16.msra.mxu0 %v467_v15 }
  0x77   :  { %571 = vmatprep.subr.bf16.mxu0 %v462_v20 }
  0x7a   :  { %572 = vmatpush1.bf16.msra.mxu0 %v461_v27  ;;  %v421_v27 = vld [vmem:[#allocation7 + $0x260] sm:$0xff] }
  0x7b   :  { %573 = vmatprep.subr.bf16.mxu0 %v456_v31  ;;  %v481_v31 = vpack.c.bf16 %v427_v28, %v421_v27 }
  0x7e   :  { %574 = vmatpush1.bf16.msra.mxu0 %v455_v35  ;;  %v398_v35 = vld [vmem:[#allocation7 + $0x1a8] sm:$0xff] }
  0x7f   :  { %575 = vmatprep.subr.bf16.mxu0 %v450_v46  ;;  %v470_v38 = vpack.c.bf16 %v404_v36, %v398_v35  ;;  %v391_v46 = vld [vmem:[#allocation7 + $0x170] sm:$0xff] }
  0x80   :  { %v463_v49 = vpack.c.bf16 %v391_v46, %v385_v45 }
  0x82   :  { %576 = vmatpush1.bf16.msra.mxu0 %v449_v47  ;;  %v374_v47 = vld [vmem:[#allocation7 + $0xe8] sm:$0xff] }
  0x83   :  { %577 = vmatprep.subr.bf16.mxu0 %v444_v58  ;;  %v458_v50 = vpack.c.bf16 %v380_v48, %v374_v47  ;;  %v367_v58 = vld [vmem:[#allocation7 + $0xb0] sm:$0xff] }
  0x84   :  { %v451_v61 = vpack.c.bf16 %v367_v58, %v361_v57 }
  0x86   :  { %578 = vmatpush1.bf16.msra.mxu0 %v443_v59  ;;  %v350_v59 = vld [vmem:[#allocation7 + $0x28] sm:$0xff] }
  0x87   :  { %v446_v62 = vpack.c.bf16 %v356_v60, %v350_v59 }
 0x109   :  { %v684_v0 = vpop.f32.mrf.mxu0 }
 0x10b   :  { %v706_v1 = vpop.f32.mrf.mxu1  ;;  %v685_v2 = vpop.f32.mrf.mxu0 }
 0x10c   :  { %v686_v8 = vadd.f32 %v685_v2, %v684_v0  ;;  %v355_v0 = vld [vmem:[#allocation7 + $0x50] sm:$0xff]  ;;  %v492_v2 = vlaneseq }
 0x10d   :  { %v707_v3 = vpop.f32.mrf.mxu1  ;;  %v687_v4 = vpop.f32.mrf.mxu0 }
 0x10e   :  { %v259_v10 = vadd.f32 %v686_v8, %v667_v9  ;;  %v708_v11 = vadd.f32 %v707_v3, %v706_v1  ;;  %v493_v3 = vshrl.u32 %v492_v2, 7 }
 0x10f   :  { %v709_v5 = vpop.f32.mrf.mxu1  ;;  %v688_v6 = vpop.f32.mrf.mxu0 }
 0x110   :  { %v299_v14 = vadd.f32 %v708_v11, %v259_v10  ;;  %v494_v4 = vsub.s32 0, %v493_v3  ;;  %v502_v5 = vsub.s32 2, %v493_v3  ;;  %v490_v6 = vld [vmem:[%s890_s4] sm:$0x3f]  ;;  %v506_v8 = vsub.s32 3, %v493_v3  ;;  %s837_s4 = smov [#allocation8]  }
 0x111   :  { %v710_v7 = vpop.f32.mrf.mxu1  ;;  %s657_s12 = sshll.u32 %s837_s4, 4  ;;  %s658_s12 = int_to_ptr.vmem [resolvable:$true] %s657_s12 }
 0x112   :  { %v498_v7 = vsub.s32 1, %v493_v3  ;;  %v495_v9 = vrot.slane %v490_v6, %v494_v4  ;;  %v503_v10 = vrot.slane %v490_v6, %v502_v5  ;;  %s803_s13 = scalar_lea.vmem %s658_s12, 768  ;;  %p808_p2 = scmp.lt.s32.totalorder %s658_s12, %s658_s12 }
 0x113   :  { %p804_p1 = scmp.ne.s32.totalorder %s658_s12, %s803_s13  ;;  %p809_p3 = scmp.lt.s32.totalorder %s803_s13, %s803_s13 }
 0x114   :  { %v499_v11 = vrot.slane %v490_v6, %v498_v7 }
 0x115   :  { %p810_p4 = por %p809_p3, %p808_p2 }
 0x117   :  { %p811_p5 = pnand %p810_p4, %p804_p1 }
 0x129   :  { %v728_v12 = vpop.f32.mrf.mxu0 }
 0x12b   :  { %v729_v13 = vpop.f32.mrf.mxu0 }
 0x12c   :  { %v730_v15 = vadd.f32 %v729_v13, %v728_v12  ;;  %v507_v12 = vrot.slane %v490_v6, %v506_v8 }
 0x12d   :  { %v731_v16 = vpop.f32.mrf.mxu0 }
 0x12e   :  { %v339_v17 = vadd.f32 %v730_v15, %v299_v14 }
 0x12f   :  { %v732_v20 = vpop.f32.mrf.mxu0 }
 0x130   :  { %v344_v23 = vmax.f32 %v339_v17, 0.0 }
 0x132   :  { %v489_v25 = vpack.c.bf16 %v344_v23, %v344_v23 }
 0x134   :  { %555 = vmatmul.mubr.bf16.vlgmr.msra.gmra.mxu1 %v489_v25  ;;  %596 = vmatmul.mubr.bf16.vlgmr.msra.gmra.mxu0 %v489_v25 }
 0x135   :  { %605 = vmatpush1.bf16.msra.mxu1 %v487_v24  ;;  %636 = vmatprep.mubr.bf16.mxu1 %v836_v63  ;;  %v349_v63 = vld [vmem:[#allocation7 + $0x20] sm:$0xff] }
 0x136   :  { %606 = vmatprep.subr.bf16.mxu1 %v482_v26  ;;  %v445_v1 = vpack.c.bf16 %v355_v0, %v349_v63  ;;  %v514_v26 = vsub.s32 5, %v493_v3 }
 0x138   :  { %v515_v28 = vrot.slane %v490_v6, %v514_v26 }
 0x139   :  { %607 = vmatpush1.bf16.msra.mxu1 %v481_v31 }
 0x13a   :  { %608 = vmatprep.subr.bf16.mxu1 %v476_v32 }
 0x13d   :  { %609 = vmatpush1.bf16.msra.mxu1 %v475_v37 }
 0x13e   :  { %610 = vmatprep.subr.bf16.mxu1 %v470_v38 }
 0x141   :  { %611 = vmatpush1.bf16.msra.mxu1 %v469_v43 }
 0x142   :  { %612 = vmatprep.subr.bf16.mxu1 %v464_v44 }
 0x145   :  { %613 = vmatpush1.bf16.msra.mxu1 %v463_v49 }
 0x146   :  { %614 = vmatprep.subr.bf16.mxu1 %v458_v50 }
 0x149   :  { %615 = vmatpush1.bf16.msra.mxu1 %v457_v55 }
 0x14a   :  { %616 = vmatprep.subr.bf16.mxu1 %v452_v56 }
 0x14d   :  { %617 = vmatpush1.bf16.msra.mxu1 %v451_v61 }
 0x14e   :  { %618 = vmatprep.subr.bf16.mxu1 %v446_v62 }
 0x151   :  { %619 = vmatpush1.bf16.msra.mxu1 %v445_v1 }
 0x154   :  { %637 = vmatmul.mubr.bf16.vlgmr.msra.gmra.mxu1 %v489_v25  ;;  %v510_v25 = vsub.s32 4, %v493_v3 }
 0x156   :  { %v511_v27 = vrot.slane %v490_v6, %v510_v25 }
 0x1f4   :  { %v556_v13 = vpop.f32.mrf.mxu1  ;;  %v597_v14 = vpop.f32.mrf.mxu0 }
 0x1f5   :  { %v557_v15 = vadd.f32 %v556_v13, %v495_v9  ;;  %v598_v16 = vadd.f32 %v597_v14, %v503_v10 }
 0x1f6   :  { %v558_v17 = vpop.f32.mrf.mxu1  ;;  %v599_v18 = vpop.f32.mrf.mxu0 }
 0x1f7   :  { %645 = vst [vmem:[#allocation8] sm:$0xff] %v557_v15  ;;  %647 = vst [vmem:[#allocation8 + $0x10] sm:$0xff] %v598_v16  ;;  %v559_v19 = vadd.f32 %v558_v17, %v499_v11  ;;  %v600_v20 = vadd.f32 %v599_v18, %v507_v12 }
 0x1f8   :  { %v560_v21 = vpop.f32.mrf.mxu1  ;;  %v601_v22 = vpop.f32.mrf.mxu0 }
 0x1f9   :  { %646 = vst [vmem:[#allocation8 + $0x8] sm:$0xff] %v559_v19  ;;  %648 = vst [vmem:[#allocation8 + $0x18] sm:$0xff] %v600_v20 }
 0x1fa   :  { %v561_v23 = vpop.f32.mrf.mxu1  ;;  %v602_v24 = vpop.f32.mrf.mxu0 }
 0x214   :  { %v638_v29 = vpop.f32.mrf.mxu1 }
 0x215   :  { %v639_v30 = vadd.f32 %v638_v29, %v511_v27 }
 0x216   :  { %v640_v31 = vpop.f32.mrf.mxu1 }
 0x217   :  { %649 = vst [vmem:[#allocation8 + $0x20] sm:$0xff] %v639_v30  ;;  %v641_v32 = vadd.f32 %v640_v31, %v515_v28 }
 0x218   :  { %v642_v33 = vpop.f32.mrf.mxu1 }
 0x219   :  { %650 = vst [vmem:[#allocation8 + $0x28] sm:$0xff] %v641_v32 }
 0x21a   :  { %v643_v34 = vpop.f32.mrf.mxu1 }
 0x21b   :  { %814 = shalt.err (!%p811_p5)
}
 0x21c   :  { %660 = dma.vmem_to_hbm [thread:$0]  %s658_s12, 768, %s891_s5, [#allocation4]  }
 0x21d   :  { %827 = dma.done.wait [#allocation4], 768  }
 0x21e   :  { %828 = vsyncadd [#allocation4], 4294966528 }
 0x21f   :  { %664 = vsyncpa [#allocation3], 1 }
 0x220   :  { %665 = vsyncpa [#allocation6], 1 }
 0x221   :  { %666 = vsyncpa [#allocation4], 1 }

// kernel: tpu_custom_call.1
= control target key start
LH: loop header
LB: loop body
LE: loop exit
PB: predicated region body
PF: predicated region fallthrough
CT: control target
= control target key end

     0   :  { %10 = vsyncpa [#allocation3], 0  ;;  %s886_s0 = inlined_call_operand.hbm [shape: f32[8,768], index: 0, kind: input, shape index: {}]   ;;  %s887_s1 = inlined_call_operand.hbm [shape: f32[768,128], index: 1, kind: input, shape index: {}]   ;;  %s888_s2 = inlined_call_operand.vmem [shape: f32[1,128], index: 2, kind: input, shape index: {}]   ;;  %s889_s3 = inlined_call_operand.hbm [shape: f32[128,768], index: 3, kind: input, shape index: {}]   ;;  %s890_s4 = inlined_call_operand.vmem [shape: f32[1,768], index: 4, kind: input, shape index: {}]   ;;  %s891_s5 = inlined_call_operand.hbm [shape: f32[8,768], index: 5, kind: output, shape index: {}]  }
   0x1   :  { %11 = vsyncpa [#allocation6], 0 }
   0x2   :  { %12 = vsyncpa [#allocation4], 0  ;;  %s829_s18 = smov [#allocation5]  }
   0x3   :  { %s28_s19 = sshll.u32 %s829_s18, 4  ;;  %s29_s19 = int_to_ptr.vmem [resolvable:$true] %s28_s19 }
   0x4   :  { %s751_s20 = scalar_lea.vmem %s29_s19, 12288  ;;  %p756_p1 = scmp.lt.s32.totalorder %s29_s19, %s29_s19 }
   0x5   :  { %p752_p0 = scmp.ne.s32.totalorder %s29_s19, %s751_s20  ;;  %p757_p2 = scmp.lt.s32.totalorder %s751_s20, %s751_s20 }
   0x7   :  { %p758_p3 = por %p757_p2, %p756_p1 }
   0x9   :  { %p759_p4 = pnand %p758_p3, %p752_p0 }
   0xb   :  { %762 = shalt.err (!%p759_p4)
}
   0xc   :  { %s830_s21 = smov 128   ;;  %s831_s22 = smov 8  }
   0xd   :  { %34 = dma.hbm_to_vmem [thread:$0]  %s887_s1, 12288, %s29_s19, [#allocation6], %s830_s21, %s830_s21, %s831_s22  }
   0xe   :  { %s832_s25 = smov [#allocation2]   ;;  %s833_s27 = smov [#allocation7]  }
   0xf   :  { %s19_s26 = sshll.u32 %s832_s25, 4  ;;  %s42_s28 = sshll.u32 %s833_s27, 4  ;;  %s20_s26 = int_to_ptr.vmem [resolvable:$true] %s19_s26  ;;  %s43_s28 = int_to_ptr.vmem [resolvable:$true] %s42_s28 }
  0x10   :  { %s771_s29 = scalar_lea.vmem %s20_s26, 768  ;;  %p776_p6 = scmp.lt.s32.totalorder %s20_s26, %s20_s26 }
  0x11   :  { %p772_p5 = scmp.ne.s32.totalorder %s20_s26, %s771_s29  ;;  %p777_p7 = scmp.lt.s32.totalorder %s771_s29, %s771_s29 }
  0x13   :  { %p778_p8 = por %p777_p7, %p776_p6 }
  0x15   :  { %p779_p9 = pnand %p778_p8, %p772_p5 }
  0x17   :  { %782 = shalt.err (!%p779_p9)
}
  0x18   :  { %22 = dma.hbm_to_vmem [thread:$0]  %s886_s0, 768, %s20_s26, [#allocation3]  }
  0x19   :  { %s791_s7 = scalar_lea.vmem %s43_s28, 12288  ;;  %p796_p11 = scmp.lt.s32.totalorder %s43_s28, %s43_s28 }
  0x1a   :  { %p792_p10 = scmp.ne.s32.totalorder %s43_s28, %s791_s7  ;;  %p797_p12 = scmp.lt.s32.totalorder %s791_s7, %s791_s7 }
  0x1c   :  { %p798_p13 = por %p797_p12, %p796_p11 }
  0x1e   :  { %p799_p0 = pnand %p798_p13, %p792_p10 }
  0x20   :  { %802 = shalt.err (!%p799_p0)
}
  0x21   :  { %s834_s1 = smov 768   ;;  %s835_s8 = smov 48  }
  0x22   :  { %48 = dma.hbm_to_vmem [thread:$0]  %s889_s3, 12288, %s43_s28, [#allocation6], %s834_s1, %s834_s1, %s835_s8  }
  0x23   :  { %823 = dma.done.wait [#allocation3], 768  }
  0x24   :  { %824 = vsyncadd [#allocation3], 4294966528 }
  0x25   :  { %825 = dma.done.wait [#allocation6], 24576  }
  0x26   :  { %826 = vsyncadd [#allocation6], 4294942720  ;;  %v103_v0 = vld [vmem:[#allocation5 + $0xf0] sm:$0xff]  ;;  %v104_v1 = vld [vmem:[#allocation5 + $0xf8] sm:$0xff] }
  0x27   :  { %v87_v2 = vld [vmem:[#allocation5 + $0x70] sm:$0xff]  ;;  %v184_v3 = vpack.c.bf16 %v104_v1, %v103_v0  ;;  %v88_v4 = vld [vmem:[#allocation5 + $0x78] sm:$0xff]  ;;  %v101_v11 = vld [vmem:[#allocation5 + $0xe0] sm:$0xff] }
  0x28   :  { %v135_v5 = vld [vmem:[#allocation5 + $0x1f0] sm:$0xff]  ;;  %v136_v6 = vld [vmem:[#allocation5 + $0x1f8] sm:$0xff]  ;;  %v176_v7 = vpack.c.bf16 %v88_v4, %v87_v2  ;;  %v102_v13 = vld [vmem:[#allocation5 + $0xe8] sm:$0xff] }
  0x29   :  { %v200_v8 = vpack.c.bf16 %v136_v6, %v135_v5  ;;  %v119_v9 = vld [vmem:[#allocation5 + $0x170] sm:$0xff]  ;;  %v120_v10 = vld [vmem:[#allocation5 + $0x178] sm:$0xff]  ;;  %668 = vmatprep.subr.bf16.mxu0 %v184_v3  ;;  %v85_v14 = vld [vmem:[#allocation5 + $0x60] sm:$0xff]  ;;  %v183_v16 = vpack.c.bf16 %v102_v13, %v101_v11 }
  0x2a   :  { %v192_v12 = vpack.c.bf16 %v120_v10, %v119_v9  ;;  %v86_v15 = vld [vmem:[#allocation5 + $0x68] sm:$0xff]  ;;  %669 = vmatpush3.bf16.msra.mxu0 %v176_v7  ;;  %v133_v18 = vld [vmem:[#allocation5 + $0x1e0] sm:$0xff]  ;;  %v99_v23 = vld [vmem:[#allocation5 + $0xd0] sm:$0xff] }
  0x2b   :  { %690 = vmatprep.subr.bf16.mxu1 %v200_v8  ;;  %v175_v17 = vpack.c.bf16 %v86_v15, %v85_v14  ;;  %v134_v19 = vld [vmem:[#allocation5 + $0x1e8] sm:$0xff]  ;;  %v117_v20 = vld [vmem:[#allocation5 + $0x160] sm:$0xff]  ;;  %v100_v24 = vld [vmem:[#allocation5 + $0xd8] sm:$0xff]  ;;  %670 = vmatprep.subr.bf16.mxu0 %v183_v16 }
  0x2c   :  { %691 = vmatpush3.bf16.msra.mxu1 %v192_v12  ;;  %v199_v21 = vpack.c.bf16 %v134_v19, %v133_v18  ;;  %v118_v22 = vld [vmem:[#allocation5 + $0x168] sm:$0xff]  ;;  %v182_v26 = vpack.c.bf16 %v100_v24, %v99_v23  ;;  %v83_v27 = vld [vmem:[#allocation5 + $0x50] sm:$0xff]  ;;  %v84_v28 = vld [vmem:[#allocation5 + $0x58] sm:$0xff] }
  0x2d   :  { %v191_v25 = vpack.c.bf16 %v118_v22, %v117_v20  ;;  %v131_v29 = vld [vmem:[#allocation5 + $0x1d0] sm:$0xff]  ;;  %v132_v30 = vld [vmem:[#allocation5 + $0x1d8] sm:$0xff]  ;;  %v174_v33 = vpack.c.bf16 %v84_v28, %v83_v27  ;;  %v97_v35 = vld [vmem:[#allocation5 + $0xc0] sm:$0xff] }
  0x2e   :  { %692 = vmatprep.subr.bf16.mxu1 %v199_v21  ;;  %v115_v31 = vld [vmem:[#allocation5 + $0x150] sm:$0xff]  ;;  %v116_v32 = vld [vmem:[#allocation5 + $0x158] sm:$0xff]  ;;  %671 = vmatpush3.bf16.msra.mxu0 %v175_v17  ;;  %v198_v34 = vpack.c.bf16 %v132_v30, %v131_v29  ;;  %v98_v36 = vld [vmem:[#allocation5 + $0xc8] sm:$0xff] }
  0x2f   :  { %v81_v37 = vld [vmem:[#allocation5 + $0x40] sm:$0xff]  ;;  %672 = vmatprep.subr.bf16.mxu0 %v182_v26  ;;  %v190_v38 = vpack.c.bf16 %v116_v32, %v115_v31  ;;  %v181_v39 = vpack.c.bf16 %v98_v36, %v97_v35  ;;  %v82_v40 = vld [vmem:[#allocation5 + $0x48] sm:$0xff]  ;;  %v95_v46 = vld [vmem:[#allocation5 + $0xb0] sm:$0xff] }
  0x30   :  { %693 = vmatpush3.bf16.msra.mxu1 %v191_v25  ;;  %v129_v41 = vld [vmem:[#allocation5 + $0x1c0] sm:$0xff]  ;;  %v130_v42 = vld [vmem:[#allocation5 + $0x1c8] sm:$0xff]  ;;  %v96_v47 = vld [vmem:[#allocation5 + $0xb8] sm:$0xff]  ;;  %v173_v48 = vpack.c.bf16 %v82_v40, %v81_v37 }
  0x31   :  { %694 = vmatprep.subr.bf16.mxu1 %v198_v34  ;;  %v197_v43 = vpack.c.bf16 %v130_v42, %v129_v41  ;;  %v113_v44 = vld [vmem:[#allocation5 + $0x140] sm:$0xff]  ;;  %v114_v45 = vld [vmem:[#allocation5 + $0x148] sm:$0xff]  ;;  %v127_v49 = vld [vmem:[#allocation5 + $0x1b0] sm:$0xff]  ;;  %v180_v52 = vpack.c.bf16 %v96_v47, %v95_v46 }
  0x32   :  { %673 = vmatpush3.bf16.msra.mxu0 %v174_v33  ;;  %v128_v50 = vld [vmem:[#allocation5 + $0x1b8] sm:$0xff]  ;;  %v189_v51 = vpack.c.bf16 %v114_v45, %v113_v44  ;;  %v79_v53 = vld [vmem:[#allocation5 + $0x30] sm:$0xff]  ;;  %v93_v58 = vld [vmem:[#allocation5 + $0xa0] sm:$0xff] }
  0x33   :  { %674 = vmatprep.subr.bf16.mxu0 %v181_v39  ;;  %v80_v54 = vld [vmem:[#allocation5 + $0x38] sm:$0xff]  ;;  %v111_v55 = vld [vmem:[#allocation5 + $0x130] sm:$0xff]  ;;  %v196_v56 = vpack.c.bf16 %v128_v50, %v127_v49  ;;  %v94_v59 = vld [vmem:[#allocation5 + $0xa8] sm:$0xff] }
  0x34   :  { %695 = vmatpush3.bf16.msra.mxu1 %v190_v38  ;;  %v112_v57 = vld [vmem:[#allocation5 + $0x138] sm:$0xff]  ;;  %v125_v60 = vld [vmem:[#allocation5 + $0x1a0] sm:$0xff]  ;;  %v126_v61 = vld [vmem:[#allocation5 + $0x1a8] sm:$0xff]  ;;  %v172_v62 = vpack.c.bf16 %v80_v54, %v79_v53  ;;  %v179_v0 = vpack.c.bf16 %v94_v59, %v93_v58 }
  0x35   :  { %696 = vmatprep.subr.bf16.mxu1 %v197_v43  ;;  %v188_v63 = vpack.c.bf16 %v112_v57, %v111_v55  ;;  %v77_v1 = vld [vmem:[#allocation5 + $0x20] sm:$0xff]  ;;  %v78_v2 = vld [vmem:[#allocation5 + $0x28] sm:$0xff]  ;;  %v195_v4 = vpack.c.bf16 %v126_v61, %v125_v60  ;;  %v91_v6 = vld [vmem:[#allocation5 + $0x90] sm:$0xff] }
  0x36   :  { %675 = vmatpush3.bf16.msra.mxu0 %v173_v48  ;;  %v109_v3 = vld [vmem:[#allocation5 + $0x120] sm:$0xff]  ;;  %v110_v5 = vld [vmem:[#allocation5 + $0x128] sm:$0xff]  ;;  %v92_v7 = vld [vmem:[#allocation5 + $0x98] sm:$0xff]  ;;  %v171_v10 = vpack.c.bf16 %v78_v2, %v77_v1 }
  0x37   :  { %676 = vmatprep.subr.bf16.mxu0 %v180_v52  ;;  %v123_v8 = vld [vmem:[#allocation5 + $0x190] sm:$0xff]  ;;  %v124_v9 = vld [vmem:[#allocation5 + $0x198] sm:$0xff]  ;;  %v187_v13 = vpack.c.bf16 %v110_v5, %v109_v3  ;;  %v178_v14 = vpack.c.bf16 %v92_v7, %v91_v6  ;;  %v89_v20 = vld [vmem:[#allocation5 + $0x80] sm:$0xff] }
  0x38   :  { %697 = vmatpush3.bf16.msra.mxu1 %v189_v51  ;;  %v75_v11 = vld [vmem:[#allocation5 + $0x10] sm:$0xff]  ;;  %v62_v12 = vld [vmem:[#allocation2 + $0x8] sm:$0xff]  ;;  %v194_v19 = vpack.c.bf16 %v124_v9, %v123_v8  ;;  %v90_v21 = vld [vmem:[#allocation5 + $0x88] sm:$0xff] }
  0x39   :  { %698 = vmatprep.subr.bf16.mxu1 %v196_v56  ;;  %v76_v15 = vld [vmem:[#allocation5 + $0x18] sm:$0xff]  ;;  %v107_v16 = vld [vmem:[#allocation5 + $0x110] sm:$0xff]  ;;  %v68_v18 = vpack.c.bf16 %v62_v12, %v62_v12  ;;  %v64_v22 = vld [vmem:[#allocation2 + $0x18] sm:$0xff]  ;;  %v177_v28 = vpack.c.bf16 %v90_v21, %v89_v20 }
  0x3a   :  { %677 = vmatpush3.bf16.msra.mxu0 %v172_v62  ;;  %v108_v17 = vld [vmem:[#allocation5 + $0x118] sm:$0xff]  ;;  %v121_v23 = vld [vmem:[#allocation5 + $0x180] sm:$0xff]  ;;  %v122_v24 = vld [vmem:[#allocation5 + $0x188] sm:$0xff]  ;;  %v70_v25 = vpack.c.bf16 %v64_v22, %v64_v22  ;;  %v170_v26 = vpack.c.bf16 %v76_v15, %v75_v11 }
  0x3b   :  { %678 = vmatprep.subr.bf16.mxu0 %v179_v0  ;;  %256 = vmatprep.mubr.bf16.mxu0 %v68_v18  ;;  %v186_v27 = vpack.c.bf16 %v108_v17, %v107_v16  ;;  %v73_v29 = vld [vmem:[#allocation5] sm:$0xff]  ;;  %v74_v30 = vld [vmem:[#allocation5 + $0x8] sm:$0xff]  ;;  %v193_v32 = vpack.c.bf16 %v122_v24, %v121_v23  ;;  %v167_v34 = vld [vmem:[#allocation5 + $0x2f0] sm:$0xff] }
  0x3c   :  { %699 = vmatpush3.bf16.msra.mxu1 %v188_v63  ;;  %v105_v31 = vld [vmem:[#allocation5 + $0x100] sm:$0xff]  ;;  %v106_v33 = vld [vmem:[#allocation5 + $0x108] sm:$0xff]  ;;  %v168_v35 = vld [vmem:[#allocation5 + $0x2f8] sm:$0xff]  ;;  %296 = vmatprep.mubr.bf16.mxu1 %v70_v25  ;;  %v169_v36 = vpack.c.bf16 %v74_v30, %v73_v29 }
  0x3d   :  { %700 = vmatprep.subr.bf16.mxu1 %v195_v4  ;;  %v61_v37 = vld [vmem:[#allocation2] sm:$0xff]  ;;  %v185_v38 = vpack.c.bf16 %v106_v33, %v105_v31  ;;  %v216_v39 = vpack.c.bf16 %v168_v35, %v167_v34  ;;  %v152_v41 = vld [vmem:[#allocation5 + $0x278] sm:$0xff]  ;;  %v63_v42 = vld [vmem:[#allocation2 + $0x10] sm:$0xff] }
  0x3e   :  { %679 = vmatpush3.bf16.msra.mxu0 %v171_v10  ;;  %v151_v40 = vld [vmem:[#allocation5 + $0x270] sm:$0xff]  ;;  %v165_v43 = vld [vmem:[#allocation5 + $0x2e0] sm:$0xff]  ;;  %v166_v44 = vld [vmem:[#allocation5 + $0x2e8] sm:$0xff]  ;;  %v67_v45 = vpack.c.bf16 %v61_v37, %v61_v37  ;;  %v69_v47 = vpack.c.bf16 %v63_v42, %v63_v42 }
  0x3f   :  { %680 = vmatprep.subr.bf16.mxu0 %v178_v14  ;;  %v208_v46 = vpack.c.bf16 %v152_v41, %v151_v40  ;;  %v215_v48 = vpack.c.bf16 %v166_v44, %v165_v43  ;;  %v149_v49 = vld [vmem:[#allocation5 + $0x260] sm:$0xff]  ;;  %v150_v50 = vld [vmem:[#allocation5 + $0x268] sm:$0xff]  ;;  %v66_v51 = vld [vmem:[#allocation2 + $0x28] sm:$0xff] }
  0x40   :  { %701 = vmatpush3.bf16.msra.mxu1 %v187_v13  ;;  %v163_v52 = vld [vmem:[#allocation5 + $0x2d0] sm:$0xff]  ;;  %v164_v53 = vld [vmem:[#allocation5 + $0x2d8] sm:$0xff]  ;;  %v72_v54 = vpack.c.bf16 %v66_v51, %v66_v51  ;;  %v207_v55 = vpack.c.bf16 %v150_v50, %v149_v49  ;;  %v161_v59 = vld [vmem:[#allocation5 + $0x2c0] sm:$0xff] }
  0x41   :  { %702 = vmatprep.subr.bf16.mxu1 %v194_v19  ;;  %v214_v56 = vpack.c.bf16 %v164_v53, %v163_v52  ;;  %v147_v57 = vld [vmem:[#allocation5 + $0x250] sm:$0xff]  ;;  %v148_v58 = vld [vmem:[#allocation5 + $0x258] sm:$0xff]  ;;  %v162_v60 = vld [vmem:[#allocation5 + $0x2c8] sm:$0xff] }
  0x42   :  { %681 = vmatpush3.bf16.msra.mxu0 %v170_v26  ;;  %v206_v61 = vpack.c.bf16 %v148_v58, %v147_v57  ;;  %v213_v62 = vpack.c.bf16 %v162_v60, %v161_v59  ;;  %v145_v63 = vld [vmem:[#allocation5 + $0x240] sm:$0xff]  ;;  %v146_v0 = vld [vmem:[#allocation5 + $0x248] sm:$0xff]  ;;  %v159_v1 = vld [vmem:[#allocation5 + $0x2b0] sm:$0xff] }
  0x43   :  { %682 = vmatprep.subr.bf16.mxu0 %v177_v28  ;;  %v160_v2 = vld [vmem:[#allocation5 + $0x2b8] sm:$0xff]  ;;  %v205_v3 = vpack.c.bf16 %v146_v0, %v145_v63  ;;  %v143_v5 = vld [vmem:[#allocation5 + $0x230] sm:$0xff]  ;;  %v157_v7 = vld [vmem:[#allocation5 + $0x2a0] sm:$0xff] }
  0x44   :  { %703 = vmatpush3.bf16.msra.mxu1 %v186_v27  ;;  %v212_v4 = vpack.c.bf16 %v160_v2, %v159_v1  ;;  %v144_v6 = vld [vmem:[#allocation5 + $0x238] sm:$0xff]  ;;  %v158_v8 = vld [vmem:[#allocation5 + $0x2a8] sm:$0xff]  ;;  %v141_v11 = vld [vmem:[#allocation5 + $0x220] sm:$0xff] }
  0x45   :  { %704 = vmatprep.subr.bf16.mxu1 %v193_v32  ;;  %v204_v9 = vpack.c.bf16 %v144_v6, %v143_v5  ;;  %v211_v10 = vpack.c.bf16 %v158_v8, %v157_v7  ;;  %v142_v12 = vld [vmem:[#allocation5 + $0x228] sm:$0xff]  ;;  %v155_v13 = vld [vmem:[#allocation5 + $0x290] sm:$0xff]  ;;  %v156_v14 = vld [vmem:[#allocation5 + $0x298] sm:$0xff] }
  0x46   :  { %683 = vmatpush3.bf16.msra.mxu0 %v169_v36  ;;  %v203_v15 = vpack.c.bf16 %v142_v12, %v141_v11  ;;  %v210_v16 = vpack.c.bf16 %v156_v14, %v155_v13  ;;  %v139_v17 = vld [vmem:[#allocation5 + $0x210] sm:$0xff]  ;;  %v140_v18 = vld [vmem:[#allocation5 + $0x218] sm:$0xff]  ;;  %v153_v19 = vld [vmem:[#allocation5 + $0x280] sm:$0xff] }
  0x47   :  { %712 = vmatprep.subr.bf16.mxu0 %v216_v39  ;;  %v154_v20 = vld [vmem:[#allocation5 + $0x288] sm:$0xff]  ;;  %v202_v21 = vpack.c.bf16 %v140_v18, %v139_v17  ;;  %v137_v23 = vld [vmem:[#allocation5 + $0x200] sm:$0xff]  ;;  %v65_v26 = vld [vmem:[#allocation2 + $0x20] sm:$0xff] }
  0x48   :  { %705 = vmatpush3.bf16.msra.mxu1 %v185_v38  ;;  %v209_v22 = vpack.c.bf16 %v154_v20, %v153_v19  ;;  %v138_v24 = vld [vmem:[#allocation5 + $0x208] sm:$0xff]  ;;  %v71_v27 = vpack.c.bf16 %v65_v26, %v65_v26  ;;  %v436_v29 = vld [vmem:[#allocation7 + $0x2d8] sm:$0xff]  ;;  %v429_v30 = vld [vmem:[#allocation7 + $0x2a0] sm:$0xff] }
  0x49   :  { %257 = vmatmul.mubr.bf16.vlgmr.msra.gmra.mxu0 %v67_v45  ;;  %v201_v25 = vpack.c.bf16 %v138_v24, %v137_v23  ;;  %v430_v28 = vld [vmem:[#allocation7 + $0x2a8] sm:$0xff]  ;;  %v435_v32 = vld [vmem:[#allocation7 + $0x2d0] sm:$0xff]  ;;  %v432_v33 = vld [vmem:[#allocation7 + $0x2b8] sm:$0xff] }
  0x4a   :  { %713 = vmatpush3.bf16.msra.mxu0 %v208_v46  ;;  %336 = vmatprep.mubr.bf16.mxu0 %v72_v54  ;;  %v484_v31 = vpack.c.bf16 %v436_v29, %v430_v28  ;;  %v438_v34 = vld [vmem:[#allocation7 + $0x2e8] sm:$0xff]  ;;  %v483_v35 = vpack.c.bf16 %v435_v32, %v429_v30  ;;  %v431_v37 = vld [vmem:[#allocation7 + $0x2b0] sm:$0xff]  ;;  %v437_v38 = vld [vmem:[#allocation7 + $0x2e0] sm:$0xff] }
  0x4b   :  { %297 = vmatmul.mubr.bf16.vlgmr.msra.gmra.mxu1 %v69_v47  ;;  %714 = vmatprep.subr.bf16.mxu0 %v215_v48  ;;  %v486_v36 = vpack.c.bf16 %v438_v34, %v432_v33  ;;  %v418_v39 = vld [vmem:[#allocation7 + $0x248] sm:$0xff]  ;;  %v485_v40 = vpack.c.bf16 %v437_v38, %v431_v37  ;;  %v424_v41 = vld [vmem:[#allocation7 + $0x278] sm:$0xff]  ;;  %v417_v42 = vld [vmem:[#allocation7 + $0x240] sm:$0xff] }
  0x4c   :  { %522 = vmatprep.subr.bf16.mxu1 %v484_v31  ;;  %v423_v43 = vld [vmem:[#allocation7 + $0x270] sm:$0xff]  ;;  %v478_v44 = vpack.c.bf16 %v424_v41, %v418_v39  ;;  %v420_v46 = vld [vmem:[#allocation7 + $0x258] sm:$0xff]  ;;  %v426_v47 = vld [vmem:[#allocation7 + $0x288] sm:$0xff] }
  0x4d   :  { %523 = vmatpush1.bf16.msra.mxu1 %v483_v35  ;;  %v477_v45 = vpack.c.bf16 %v423_v43, %v417_v42  ;;  %v419_v48 = vld [vmem:[#allocation7 + $0x250] sm:$0xff]  ;;  %v480_v49 = vpack.c.bf16 %v426_v47, %v420_v46  ;;  %v425_v50 = vld [vmem:[#allocation7 + $0x280] sm:$0xff]  ;;  %v406_v51 = vld [vmem:[#allocation7 + $0x1e8] sm:$0xff] }
  0x4e   :  { %715 = vmatpush3.bf16.msra.mxu0 %v207_v55  ;;  %v412_v52 = vld [vmem:[#allocation7 + $0x218] sm:$0xff]  ;;  %524 = vmatprep.subr.bf16.mxu1 %v478_v44  ;;  %v479_v53 = vpack.c.bf16 %v425_v50, %v419_v48  ;;  %v405_v55 = vld [vmem:[#allocation7 + $0x1e0] sm:$0xff]  ;;  %v414_v58 = vld [vmem:[#allocation7 + $0x228] sm:$0xff] }
  0x4f   :  { %716 = vmatprep.subr.bf16.mxu0 %v214_v56  ;;  %v472_v54 = vpack.c.bf16 %v412_v52, %v406_v51  ;;  %v411_v56 = vld [vmem:[#allocation7 + $0x210] sm:$0xff]  ;;  %v408_v57 = vld [vmem:[#allocation7 + $0x1f8] sm:$0xff]  ;;  %v413_v60 = vld [vmem:[#allocation7 + $0x220] sm:$0xff] }
  0x50   :  { %v407_v59 = vld [vmem:[#allocation7 + $0x1f0] sm:$0xff]  ;;  %v394_v63 = vld [vmem:[#allocation7 + $0x188] sm:$0xff]  ;;  %v400_v0 = vld [vmem:[#allocation7 + $0x1b8] sm:$0xff] }
  0x51   :  { %525 = vmatpush1.bf16.msra.mxu1 %v477_v45  ;;  %v393_v1 = vld [vmem:[#allocation7 + $0x180] sm:$0xff]  ;;  %v473_v2 = vpack.c.bf16 %v413_v60, %v407_v59  ;;  %v396_v5 = vld [vmem:[#allocation7 + $0x198] sm:$0xff]  ;;  %v402_v6 = vld [vmem:[#allocation7 + $0x1c8] sm:$0xff] }
  0x52   :  { %717 = vmatpush3.bf16.msra.mxu0 %v206_v61  ;;  %v471_v61 = vpack.c.bf16 %v411_v56, %v405_v55  ;;  %526 = vmatprep.subr.bf16.mxu1 %v472_v54  ;;  %v468_v7 = vpack.c.bf16 %v402_v6, %v396_v5  ;;  %v395_v8 = vld [vmem:[#allocation7 + $0x190] sm:$0xff]  ;;  %v388_v11 = vld [vmem:[#allocation7 + $0x158] sm:$0xff]  ;;  %v390_v14 = vld [vmem:[#allocation7 + $0x168] sm:$0xff] }
  0x53   :  { %718 = vmatprep.subr.bf16.mxu0 %v213_v62  ;;  %v474_v62 = vpack.c.bf16 %v414_v58, %v408_v57  ;;  %v384_v13 = vld [vmem:[#allocation7 + $0x138] sm:$0xff]  ;;  %v381_v17 = vld [vmem:[#allocation7 + $0x120] sm:$0xff]  ;;  %v387_v18 = vld [vmem:[#allocation7 + $0x150] sm:$0xff] }
  0x54   :  { %v383_v19 = vld [vmem:[#allocation7 + $0x130] sm:$0xff]  ;;  %v462_v20 = vpack.c.bf16 %v390_v14, %v384_v13  ;;  %v376_v23 = vld [vmem:[#allocation7 + $0xf8] sm:$0xff]  ;;  %v459_v26 = vpack.c.bf16 %v387_v18, %v381_v17  ;;  %v369_v29 = vld [vmem:[#allocation7 + $0xc0] sm:$0xff] }
  0x55   :  { %527 = vmatpush1.bf16.msra.mxu1 %v471_v61  ;;  %v372_v24 = vld [vmem:[#allocation7 + $0xd8] sm:$0xff]  ;;  %v375_v30 = vld [vmem:[#allocation7 + $0xf0] sm:$0xff]  ;;  %v377_v34 = vld [vmem:[#allocation7 + $0x100] sm:$0xff] }
  0x56   :  { %719 = vmatpush3.bf16.msra.mxu0 %v205_v3  ;;  %v466_v3 = vpack.c.bf16 %v400_v0, %v394_v63  ;;  %v453_v32 = vpack.c.bf16 %v375_v30, %v369_v29  ;;  %v371_v33 = vld [vmem:[#allocation7 + $0xd0] sm:$0xff]  ;;  %v364_v37 = vld [vmem:[#allocation7 + $0x98] sm:$0xff]  ;;  %v357_v39 = vld [vmem:[#allocation7 + $0x60] sm:$0xff]  ;;  %v836_v63 = vmov 0  }
  0x57   :  { %720 = vmatprep.subr.bf16.mxu0 %v212_v4  ;;  %v399_v4 = vld [vmem:[#allocation7 + $0x1b0] sm:$0xff]  ;;  %v455_v35 = vpack.c.bf16 %v377_v34, %v371_v33  ;;  %v360_v41 = vld [vmem:[#allocation7 + $0x78] sm:$0xff]  ;;  %v366_v43 = vld [vmem:[#allocation7 + $0xa8] sm:$0xff]  ;;  %554 = vmatprep.mubr.bf16.mxu1 %v836_v63 }
  0x58   :  { %v465_v12 = vpack.c.bf16 %v399_v4, %v393_v1  ;;  %528 = vmatprep.subr.bf16.mxu1 %v466_v3  ;;  %v359_v44 = vld [vmem:[#allocation7 + $0x70] sm:$0xff]  ;;  %v365_v45 = vld [vmem:[#allocation7 + $0xa0] sm:$0xff]  ;;  %v450_v46 = vpack.c.bf16 %v366_v43, %v360_v41  ;;  %v346_v48 = vld [vmem:[#allocation7 + $0x8] sm:$0xff] }
  0x59   :  { %v449_v47 = vpack.c.bf16 %v365_v45, %v359_v44  ;;  %v345_v51 = vld [vmem:[#allocation7] sm:$0xff]  ;;  %v351_v52 = vld [vmem:[#allocation7 + $0x30] sm:$0xff]  ;;  %v354_v55 = vld [vmem:[#allocation7 + $0x48] sm:$0xff] }
  0x5a   :  { %721 = vmatpush3.bf16.msra.mxu0 %v204_v9  ;;  %v401_v9 = vld [vmem:[#allocation7 + $0x1c0] sm:$0xff]  ;;  %529 = vmatpush1.bf16.msra.mxu1 %v465_v12  ;;  %v441_v54 = vpack.c.bf16 %v351_v52, %v345_v51  ;;  %v347_v56 = vld [vmem:[#allocation7 + $0x10] sm:$0xff]  ;;  %v434_v60 = vld [vmem:[#allocation7 + $0x2c8] sm:$0xff] }
  0x5b   :  { %722 = vmatprep.subr.bf16.mxu0 %v211_v10  ;;  %v382_v10 = vld [vmem:[#allocation7 + $0x128] sm:$0xff]  ;;  %v353_v57 = vld [vmem:[#allocation7 + $0x40] sm:$0xff]  ;;  %v440_v61 = vld [vmem:[#allocation7 + $0x2f8] sm:$0xff] }
  0x5c   :  { %v443_v59 = vpack.c.bf16 %v353_v57, %v347_v56  ;;  %v433_v18 = vld [vmem:[#allocation7 + $0x2c0] sm:$0xff]  ;;  %v410_v29 = vld [vmem:[#allocation7 + $0x208] sm:$0xff]  ;;  %v416_v30 = vld [vmem:[#allocation7 + $0x238] sm:$0xff] }
  0x5d   :  { %v409_v33 = vld [vmem:[#allocation7 + $0x200] sm:$0xff]  ;;  %v415_v34 = vld [vmem:[#allocation7 + $0x230] sm:$0xff]  ;;  %v386_v41 = vld [vmem:[#allocation7 + $0x148] sm:$0xff] }
  0x5e   :  { %723 = vmatpush3.bf16.msra.mxu0 %v203_v15  ;;  %v467_v15 = vpack.c.bf16 %v401_v9, %v395_v8  ;;  %v667_v9 = vld [vmem:[%s888_s2] ss:$0 sm:$0xff]  ;;  %v385_v45 = vld [vmem:[#allocation7 + $0x140] sm:$0xff] }
  0x5f   :  { %724 = vmatprep.subr.bf16.mxu0 %v210_v16  ;;  %v460_v16 = vpack.c.bf16 %v388_v11, %v382_v10  ;;  %v373_v51 = vld [vmem:[#allocation7 + $0xe0] sm:$0xff]  ;;  %v379_v52 = vld [vmem:[#allocation7 + $0x110] sm:$0xff] }
  0x60   :  { %v361_v57 = vld [vmem:[#allocation7 + $0x80] sm:$0xff] }
  0x61   :  { %530 = vmatprep.subr.bf16.mxu1 %v460_v16 }
  0x62   :  { %725 = vmatpush3.bf16.msra.mxu0 %v202_v21  ;;  %v389_v21 = vld [vmem:[#allocation7 + $0x160] sm:$0xff]  ;;  %531 = vmatpush1.bf16.msra.mxu1 %v459_v26 }
  0x63   :  { %726 = vmatprep.subr.bf16.mxu0 %v209_v22  ;;  %v370_v22 = vld [vmem:[#allocation7 + $0xc8] sm:$0xff] }
  0x64   :  { %v454_v28 = vpack.c.bf16 %v376_v23, %v370_v22  ;;  %v428_v22 = vld [vmem:[#allocation7 + $0x298] sm:$0xff] }
  0x66   :  { %727 = vmatpush3.bf16.msra.mxu0 %v201_v25  ;;  %v378_v25 = vld [vmem:[#allocation7 + $0x108] sm:$0xff]  ;;  %532 = vmatprep.subr.bf16.mxu1 %v454_v28  ;;  %v427_v28 = vld [vmem:[#allocation7 + $0x290] sm:$0xff] }
  0x67   :  { %563 = vmatprep.subr.bf16.mxu0 %v486_v36  ;;  %v456_v31 = vpack.c.bf16 %v378_v25, %v372_v24  ;;  %533 = vmatpush1.bf16.msra.mxu1 %v453_v32  ;;  %v358_v36 = vld [vmem:[#allocation7 + $0x68] sm:$0xff]  ;;  %v476_v32 = vpack.c.bf16 %v416_v30, %v410_v29 }
  0x68   :  { %v448_v38 = vpack.c.bf16 %v364_v37, %v358_v36  ;;  %v404_v36 = vld [vmem:[#allocation7 + $0x1d8] sm:$0xff]  ;;  %v475_v37 = vpack.c.bf16 %v415_v34, %v409_v33 }
  0x69   :  { %337 = vmatmul.mubr.bf16.vlgmr.msra.gmra.mxu0 %v71_v27  ;;  %v461_v27 = vpack.c.bf16 %v389_v21, %v383_v19  ;;  %v439_v19 = vld [vmem:[#allocation7 + $0x2f0] sm:$0xff]  ;;  %v422_v21 = vld [vmem:[#allocation7 + $0x268] sm:$0xff] }
  0x6a   :  { %564 = vmatpush1.bf16.msra.mxu0 %v485_v40  ;;  %v363_v40 = vld [vmem:[#allocation7 + $0x90] sm:$0xff]  ;;  %534 = vmatprep.subr.bf16.mxu1 %v448_v38  ;;  %v487_v24 = vpack.c.bf16 %v439_v19, %v433_v18  ;;  %v482_v26 = vpack.c.bf16 %v428_v22, %v422_v21 }
  0x6b   :  { %565 = vmatprep.subr.bf16.mxu0 %v480_v49  ;;  %v447_v42 = vpack.c.bf16 %v363_v40, %v357_v39  ;;  %v352_v49 = vld [vmem:[#allocation7 + $0x38] sm:$0xff]  ;;  %595 = vmatprep.mubr.bf16.mxu0 %v836_v63  ;;  %v397_v39 = vld [vmem:[#allocation7 + $0x1a0] sm:$0xff]  ;;  %v403_v40 = vld [vmem:[#allocation7 + $0x1d0] sm:$0xff] }
  0x6c   :  { %v442_v50 = vpack.c.bf16 %v352_v49, %v346_v48  ;;  %v469_v43 = vpack.c.bf16 %v403_v40, %v397_v39  ;;  %v380_v48 = vld [vmem:[#allocation7 + $0x118] sm:$0xff] }
  0x6d   :  { %535 = vmatpush1.bf16.msra.mxu1 %v447_v42  ;;  %v392_v42 = vld [vmem:[#allocation7 + $0x178] sm:$0xff] }
  0x6e   :  { %566 = vmatpush1.bf16.msra.mxu0 %v479_v53  ;;  %v348_v53 = vld [vmem:[#allocation7 + $0x18] sm:$0xff]  ;;  %536 = vmatprep.subr.bf16.mxu1 %v442_v50  ;;  %v464_v44 = vpack.c.bf16 %v392_v42, %v386_v41 }
  0x6f   :  { %567 = vmatprep.subr.bf16.mxu0 %v474_v62  ;;  %v444_v58 = vpack.c.bf16 %v354_v55, %v348_v53  ;;  %v488_v62 = vpack.c.bf16 %v440_v61, %v434_v60  ;;  %v362_v53 = vld [vmem:[#allocation7 + $0x88] sm:$0xff]  ;;  %v457_v55 = vpack.c.bf16 %v379_v52, %v373_v51  ;;  %v356_v60 = vld [vmem:[#allocation7 + $0x58] sm:$0xff] }
  0x71   :  { %537 = vmatpush1.bf16.msra.mxu1 %v441_v54  ;;  %v368_v54 = vld [vmem:[#allocation7 + $0xb8] sm:$0xff] }
  0x72   :  { %568 = vmatpush1.bf16.msra.mxu0 %v473_v2  ;;  %604 = vmatprep.subr.bf16.mxu1 %v488_v62  ;;  %v452_v56 = vpack.c.bf16 %v368_v54, %v362_v53 }
  0x73   :  { %569 = vmatprep.subr.bf16.mxu0 %v468_v7 }
  0x76   :  { %570 = vmatpush1.bf16.msra.mxu0 %v467_v15 }
  0x77   :  { %571 = vmatprep.subr.bf16.mxu0 %v462_v20 }
  0x7a   :  { %572 = vmatpush1.bf16.msra.mxu0 %v461_v27  ;;  %v421_v27 = vld [vmem:[#allocation7 + $0x260] sm:$0xff] }
  0x7b   :  { %573 = vmatprep.subr.bf16.mxu0 %v456_v31  ;;  %v481_v31 = vpack.c.bf16 %v427_v28, %v421_v27 }
  0x7e   :  { %574 = vmatpush1.bf16.msra.mxu0 %v455_v35  ;;  %v398_v35 = vld [vmem:[#allocation7 + $0x1a8] sm:$0xff] }
  0x7f   :  { %575 = vmatprep.subr.bf16.mxu0 %v450_v46  ;;  %v470_v38 = vpack.c.bf16 %v404_v36, %v398_v35  ;;  %v391_v46 = vld [vmem:[#allocation7 + $0x170] sm:$0xff] }
  0x80   :  { %v463_v49 = vpack.c.bf16 %v391_v46, %v385_v45 }
  0x82   :  { %576 = vmatpush1.bf16.msra.mxu0 %v449_v47  ;;  %v374_v47 = vld [vmem:[#allocation7 + $0xe8] sm:$0xff] }
  0x83   :  { %577 = vmatprep.subr.bf16.mxu0 %v444_v58  ;;  %v458_v50 = vpack.c.bf16 %v380_v48, %v374_v47  ;;  %v367_v58 = vld [vmem:[#allocation7 + $0xb0] sm:$0xff] }
  0x84   :  { %v451_v61 = vpack.c.bf16 %v367_v58, %v361_v57 }
  0x86   :  { %578 = vmatpush1.bf16.msra.mxu0 %v443_v59  ;;  %v350_v59 = vld [vmem:[#allocation7 + $0x28] sm:$0xff] }
  0x87   :  { %v446_v62 = vpack.c.bf16 %v356_v60, %v350_v59 }
 0x109   :  { %v684_v0 = vpop.f32.mrf.mxu0 }
 0x10b   :  { %v706_v1 = vpop.f32.mrf.mxu1  ;;  %v685_v2 = vpop.f32.mrf.mxu0 }
 0x10c   :  { %v686_v8 = vadd.f32 %v685_v2, %v684_v0  ;;  %v355_v0 = vld [vmem:[#allocation7 + $0x50] sm:$0xff]  ;;  %v492_v2 = vlaneseq }
 0x10d   :  { %v707_v3 = vpop.f32.mrf.mxu1  ;;  %v687_v4 = vpop.f32.mrf.mxu0 }
 0x10e   :  { %v259_v10 = vadd.f32 %v686_v8, %v667_v9  ;;  %v708_v11 = vadd.f32 %v707_v3, %v706_v1  ;;  %v493_v3 = vshrl.u32 %v492_v2, 7 }
 0x10f   :  { %v709_v5 = vpop.f32.mrf.mxu1  ;;  %v688_v6 = vpop.f32.mrf.mxu0 }
 0x110   :  { %v299_v14 = vadd.f32 %v708_v11, %v259_v10  ;;  %v494_v4 = vsub.s32 0, %v493_v3  ;;  %v502_v5 = vsub.s32 2, %v493_v3  ;;  %v490_v6 = vld [vmem:[%s890_s4] sm:$0x3f]  ;;  %v506_v8 = vsub.s32 3, %v493_v3  ;;  %s837_s4 = smov [#allocation8]  }
 0x111   :  { %v710_v7 = vpop.f32.mrf.mxu1  ;;  %s657_s12 = sshll.u32 %s837_s4, 4  ;;  %s658_s12 = int_to_ptr.vmem [resolvable:$true] %s657_s12 }
 0x112   :  { %v498_v7 = vsub.s32 1, %v493_v3  ;;  %v495_v9 = vrot.slane %v490_v6, %v494_v4  ;;  %v503_v10 = vrot.slane %v490_v6, %v502_v5  ;;  %s803_s13 = scalar_lea.vmem %s658_s12, 768  ;;  %p808_p2 = scmp.lt.s32.totalorder %s658_s12, %s658_s12 }
 0x113   :  { %p804_p1 = scmp.ne.s32.totalorder %s658_s12, %s803_s13  ;;  %p809_p3 = scmp.lt.s32.totalorder %s803_s13, %s803_s13 }
 0x114   :  { %v499_v11 = vrot.slane %v490_v6, %v498_v7 }
 0x115   :  { %p810_p4 = por %p809_p3, %p808_p2 }
 0x117   :  { %p811_p5 = pnand %p810_p4, %p804_p1 }
 0x129   :  { %v728_v12 = vpop.f32.mrf.mxu0 }
 0x12b   :  { %v729_v13 = vpop.f32.mrf.mxu0 }
 0x12c   :  { %v730_v15 = vadd.f32 %v729_v13, %v728_v12  ;;  %v507_v12 = vrot.slane %v490_v6, %v506_v8 }
 0x12d   :  { %v731_v16 = vpop.f32.mrf.mxu0 }
 0x12e   :  { %v339_v17 = vadd.f32 %v730_v15, %v299_v14 }
 0x12f   :  { %v732_v20 = vpop.f32.mrf.mxu0 }
 0x130   :  { %v344_v23 = vmax.f32 %v339_v17, 0.0 }
 0x132   :  { %v489_v25 = vpack.c.bf16 %v344_v23, %v344_v23 }
 0x134   :  { %555 = vmatmul.mubr.bf16.vlgmr.msra.gmra.mxu1 %v489_v25  ;;  %596 = vmatmul.mubr.bf16.vlgmr.msra.gmra.mxu0 %v489_v25 }
 0x135   :  { %605 = vmatpush1.bf16.msra.mxu1 %v487_v24  ;;  %636 = vmatprep.mubr.bf16.mxu1 %v836_v63  ;;  %v349_v63 = vld [vmem:[#allocation7 + $0x20] sm:$0xff] }
 0x136   :  { %606 = vmatprep.subr.bf16.mxu1 %v482_v26  ;;  %v445_v1 = vpack.c.bf16 %v355_v0, %v349_v63  ;;  %v514_v26 = vsub.s32 5, %v493_v3 }
 0x138   :  { %v515_v28 = vrot.slane %v490_v6, %v514_v26 }
 0x139   :  { %607 = vmatpush1.bf16.msra.mxu1 %v481_v31 }
 0x13a   :  { %608 = vmatprep.subr.bf16.mxu1 %v476_v32 }
 0x13d   :  { %609 = vmatpush1.bf16.msra.mxu1 %v475_v37 }
 0x13e   :  { %610 = vmatprep.subr.bf16.mxu1 %v470_v38 }
 0x141   :  { %611 = vmatpush1.bf16.msra.mxu1 %v469_v43 }
 0x142   :  { %612 = vmatprep.subr.bf16.mxu1 %v464_v44 }
 0x145   :  { %613 = vmatpush1.bf16.msra.mxu1 %v463_v49 }
 0x146   :  { %614 = vmatprep.subr.bf16.mxu1 %v458_v50 }
 0x149   :  { %615 = vmatpush1.bf16.msra.mxu1 %v457_v55 }
 0x14a   :  { %616 = vmatprep.subr.bf16.mxu1 %v452_v56 }
 0x14d   :  { %617 = vmatpush1.bf16.msra.mxu1 %v451_v61 }
 0x14e   :  { %618 = vmatprep.subr.bf16.mxu1 %v446_v62 }
 0x151   :  { %619 = vmatpush1.bf16.msra.mxu1 %v445_v1 }
 0x154   :  { %637 = vmatmul.mubr.bf16.vlgmr.msra.gmra.mxu1 %v489_v25  ;;  %v510_v25 = vsub.s32 4, %v493_v3 }
 0x156   :  { %v511_v27 = vrot.slane %v490_v6, %v510_v25 }
 0x1f4   :  { %v556_v13 = vpop.f32.mrf.mxu1  ;;  %v597_v14 = vpop.f32.mrf.mxu0 }
 0x1f5   :  { %v557_v15 = vadd.f32 %v556_v13, %v495_v9  ;;  %v598_v16 = vadd.f32 %v597_v14, %v503_v10 }
 0x1f6   :  { %v558_v17 = vpop.f32.mrf.mxu1  ;;  %v599_v18 = vpop.f32.mrf.mxu0 }
 0x1f7   :  { %645 = vst [vmem:[#allocation8] sm:$0xff] %v557_v15  ;;  %647 = vst [vmem:[#allocation8 + $0x10] sm:$0xff] %v598_v16  ;;  %v559_v19 = vadd.f32 %v558_v17, %v499_v11  ;;  %v600_v20 = vadd.f32 %v599_v18, %v507_v12 }
 0x1f8   :  { %v560_v21 = vpop.f32.mrf.mxu1  ;;  %v601_v22 = vpop.f32.mrf.mxu0 }
 0x1f9   :  { %646 = vst [vmem:[#allocation8 + $0x8] sm:$0xff] %v559_v19  ;;  %648 = vst [vmem:[#allocation8 + $0x18] sm:$0xff] %v600_v20 }
 0x1fa   :  { %v561_v23 = vpop.f32.mrf.mxu1  ;;  %v602_v24 = vpop.f32.mrf.mxu0 }
 0x214   :  { %v638_v29 = vpop.f32.mrf.mxu1 }
 0x215   :  { %v639_v30 = vadd.f32 %v638_v29, %v511_v27 }
 0x216   :  { %v640_v31 = vpop.f32.mrf.mxu1 }
 0x217   :  { %649 = vst [vmem:[#allocation8 + $0x20] sm:$0xff] %v639_v30  ;;  %v641_v32 = vadd.f32 %v640_v31, %v515_v28 }
 0x218   :  { %v642_v33 = vpop.f32.mrf.mxu1 }
 0x219   :  { %650 = vst [vmem:[#allocation8 + $0x28] sm:$0xff] %v641_v32 }
 0x21a   :  { %v643_v34 = vpop.f32.mrf.mxu1 }
 0x21b   :  { %814 = shalt.err (!%p811_p5)
}
 0x21c   :  { %660 = dma.vmem_to_hbm [thread:$0]  %s658_s12, 768, %s891_s5, [#allocation4]  }
 0x21d   :  { %827 = dma.done.wait [#allocation4], 768  }
 0x21e   :  { %828 = vsyncadd [#allocation4], 4294966528 }
 0x21f   :  { %664 = vsyncpa [#allocation3], 1 }
 0x220   :  { %665 = vsyncpa [#allocation6], 1 }
 0x221   :  { %666 = vsyncpa [#allocation4], 1 }

</bundles_post_ra>
